<compile_context>
chip_gen: v7x
topology: tpu7x:2x2x1
jax: 0.10.0
libtpu: 0.0.40
codegen_flags: <defaults>
</compile_context>

<pallas_src>
import functools

import jax
import jax.numpy as jnp
from jax.experimental import pallas as pl
from jax.experimental.pallas import tpu as pltpu

C_IN, C_MID, C_OUT, K = 1024, 32, 20, 7
PAD = K // 2          # conv "same" padding = 3
HALO = 8              # sublane-aligned halo rows per side (covers the +/-6 receptive field)
NF = 256              # K*C_MID (=224) padded to two full 128-lane groups


def _round_up(x, m):
    return (x + m - 1) // m * m


def _cdiv(a, b):
    return -(-a // b)


def pssm_head_kernel(xm_ref, xb_ref, xa_ref, w1f_ref, b1_ref, w2_ref, b2_ref,
                     o_ref, zw_ref, *, L, TL):
    """One (batch, sequence-tile) per grid step.

    xm_ref : (1, TL, C_IN)      f32  main sequence tile (rows [t*TL, t*TL+TL))
    xb_ref : (1, HALO, C_IN)    f32  8 rows before the tile (clipped at boundaries)
    xa_ref : (1, HALO, C_IN)    f32  8 rows after the tile (clipped at boundaries)
    w1f_ref: (C_IN, NF)         bf16 conv1 weights, taps fused (and zero-padded) on N
    b1_ref : (1, C_MID)         f32
    w2_ref : (K, C_MID, C_OUT)  f32  conv2 weights per tap
    b2_ref : (1, C_OUT)         f32
    o_ref  : (1, TL, C_OUT)     f32  softmax probabilities
    zw_ref : (TL+2*HALO, NF)    f32  scratch: conv1 per-tap partials for the window
    """
    t = pl.program_id(1)
    base = t * TL                          # global row of the tile's first output row
    w1 = w1f_ref[...]                      # (C_IN, NF) bf16

    def conv1_piece(x_rows, g0, n):
        # Rows correspond to global sequence rows [g0, g0+n).  Rows outside [0, L)
        # are forced to zero: this implements conv1's zero padding and also kills
        # garbage from clipped halo blocks / the ragged last tile.
        z = jnp.dot(x_rows.astype(jnp.bfloat16), w1,
                    preferred_element_type=jnp.float32)          # (n, NF)
        g = g0 + jax.lax.broadcasted_iota(jnp.int32, (n, 1), 0)
        return jnp.where((g >= 0) & (g < L), z, 0.0)

    # ---- Conv1d(1024 -> 32, k=7, pad=3): one wide MXU matmul per piece -----------
    # zw row w holds the per-tap partials for global row (base - HALO + w).
    zw_ref[pl.ds(0, HALO), :] = conv1_piece(xb_ref[0], base - HALO, HALO)
    zw_ref[pl.ds(HALO, TL), :] = conv1_piece(xm_ref[0], base, TL)
    zw_ref[pl.ds(HALO + TL, HALO), :] = conv1_piece(xa_ref[0], base + TL, HALO)

    # Tap collapse: h[m] = conv1 output at global row (base - 4 + m), m in [0, TL+8)
    TLe = TL + HALO
    h = jnp.zeros((TLe, C_MID), jnp.float32)
    for k in range(K):                      # static unroll: shifted ref-window adds
        h = h + zw_ref[pl.ds(1 + k, TLe), pl.ds(k * C_MID, C_MID)]
    h = jnp.maximum(h + b1_ref[...], 0.0)   # bias + ReLU; Dropout(0.25) is identity in eval

    # Conv2 zero-pads the *hidden* sequence: zero h outside the real sequence [0, L).
    gh = (base - HALO // 2) + jax.lax.broadcasted_iota(jnp.int32, (TLe, 1), 0)
    h = jnp.where((gh >= 0) & (gh < L), h, 0.0)

    # ---- Conv1d(32 -> 20, k=7, pad=3): 7 small f32 matmuls, f32 accumulation ------
    w2 = w2_ref[...]                        # (K, C_MID, C_OUT)
    y = jnp.zeros((TL, C_OUT), jnp.float32)
    for k in range(K):
        y = y + jnp.dot(h[1 + k:1 + k + TL], w2[k],
                        preferred_element_type=jnp.float32)
    y = y + b2_ref[...]

    # ---- softmax over the 20 classes (exact divide so rows sum to 1) --------------
    y = y - jnp.max(y, axis=-1, keepdims=True)
    e = jnp.exp(y)
    o_ref[0] = (e / jnp.sum(e, axis=-1, keepdims=True)).astype(o_ref.dtype)


def pssm_head1(x, w1, b1, w2, b2, *, tile_l=1024):
    """x: (B, L, 1024) -> (B, L, 20) softmax probabilities (PSSMHead1, eval mode)."""
    B, L, _ = x.shape

    # Physical length handed to pallas (padded only for degenerate tiny inputs).
    Lp, xp = L, x
    if Lp < 16:
        xp = jnp.pad(x, ((0, 0), (0, 16 - Lp), (0, 0)))
        Lp = 16

    TL = min(_round_up(max(tile_l, 16), 16), (Lp // 16) * 16)   # multiple of 16, <= Lp
    if B == 1 and Lp >= 256:
        TL = min(TL, max(128, (Lp // 2 // 16) * 16))   # >= 2 tiles for the 2nd v7x core
    nT = _cdiv(Lp, TL)
    nb8 = _cdiv(Lp, 8)                                  # 8-row blocks for the halo specs
    TL8 = TL // 8

    # Conv1 weights with the 7 taps fused along the matmul N dim, padded 224 -> 256.
    w1f = jnp.transpose(w1, (1, 0, 2)).reshape(C_IN, K * C_MID)
    w1f = jnp.pad(w1f, ((0, 0), (0, NF - K * C_MID))).astype(jnp.bfloat16)   # (1024, 256)
    b1r = jnp.reshape(b1, (1, C_MID)).astype(jnp.float32)
    w2r = w2.astype(jnp.float32)                                             # (7, 32, 20)
    b2r = jnp.reshape(b2, (1, C_OUT)).astype(jnp.float32)

    def before_map(b, t):   # 8 rows just before the tile; clipped at the left edge
        return (b, jnp.minimum(jnp.maximum(t * TL8 - 1, 0), nb8 - 1), 0)

    def after_map(b, t):    # 8 rows just after the tile; clipped at the right edge
        return (b, jnp.minimum((t + 1) * TL8, nb8 - 1), 0)

    kernel = functools.partial(pssm_head_kernel, L=L, TL=TL)
    out = pl.pallas_call(
        kernel,
        out_shape=jax.ShapeDtypeStruct((B, Lp, C_OUT), jnp.float32),
        grid_spec=pltpu.PrefetchScalarGridSpec(
            num_scalar_prefetch=0,
            grid=(B, nT),
            in_specs=[
                pl.BlockSpec((1, TL, C_IN), lambda b, t: (b, t, 0)),     # main tile
                pl.BlockSpec((1, HALO, C_IN), before_map),               # halo before
                pl.BlockSpec((1, HALO, C_IN), after_map),                # halo after
                pl.BlockSpec((C_IN, NF), lambda b, t: (0, 0)),
                pl.BlockSpec((1, C_MID), lambda b, t: (0, 0)),
                pl.BlockSpec((K, C_MID, C_OUT), lambda b, t: (0, 0, 0)),
                pl.BlockSpec((1, C_OUT), lambda b, t: (0, 0)),
            ],
            out_specs=pl.BlockSpec((1, TL, C_OUT), lambda b, t: (b, t, 0)),
            scratch_shapes=[pltpu.VMEM((TL + 2 * HALO, NF), jnp.float32)],
        ),
        compiler_params=pltpu.CompilerParams(
            dimension_semantics=("parallel", "parallel"),
            vmem_limit_bytes=32 * 1024 * 1024),
    )(xp, xp, xp, w1f, b1r, w2r, b2r)
    return out[:, :L, :]


def ref_pssm(x, w1, b1, w2, b2):
    """Pure-JAX f32 reference (matches PyTorch Conv1d cross-correlation semantics)."""
    dn = ('NWC', 'WIO', 'NWC')
    h = jax.lax.conv_general_dilated(x, w1, (1,), ((PAD, PAD),), dimension_numbers=dn)
    h = jax.nn.relu(h + b1.reshape(1, 1, C_MID))
    y = jax.lax.conv_general_dilated(h, w2, (1,), ((PAD, PAD),), dimension_numbers=dn)
    y = y + b2.reshape(1, 1, C_OUT)
    return jax.nn.softmax(y, axis=-1)


if __name__ == "__main__":
    key = jax.random.PRNGKey(0)
    k_x, k_w1, k_b1, k_w2, k_b2 = jax.random.split(key, 5)

    # Small shapes; tile_l=16 forces 3 sequence tiles (clipped halos + ragged tail).
    B, L = 2, 40
    x = jax.random.normal(k_x, (B, L, C_IN), dtype=jnp.float32)
    w1 = 0.02 * jax.random.normal(k_w1, (K, C_IN, C_MID), dtype=jnp.float32)
    b1 = 0.01 * jax.random.normal(k_b1, (C_MID,), dtype=jnp.float32)
    w2 = 0.02 * jax.random.normal(k_w2, (K, C_MID, C_OUT), dtype=jnp.float32)
    b2 = 0.01 * jax.random.normal(k_b2, (C_OUT,), dtype=jnp.float32)

    ref = jax.block_until_ready(ref_pssm(x, w1, b1, w2, b2))

    # Multi-tile path (TL=16, nT=3, ragged last tile).
    pssm_a = jax.block_until_ready(pssm_head1(x, w1, b1, w2, b2, tile_l=16))
    assert pssm_a.shape == (B, L, C_OUT)
    err_a = float(jnp.max(jnp.abs(pssm_a - ref)))
    assert err_a < 2e-2, f"max abs err (tile_l=16) vs reference = {err_a}"

    # Default-tile path (TL capped by L, nT=2).
    pssm_b = jax.block_until_ready(pssm_head1(x, w1, b1, w2, b2))
    err_b = float(jnp.max(jnp.abs(pssm_b - ref)))
    assert err_b < 2e-2, f"max abs err (default tile) vs reference = {err_b}"

    print("KERNEL_OK")
</pallas_src>

<mosaic_0001>
module attributes {stable_mosaic.version = 11 : i64} {
  func.func @pssm_head_kernel(%arg0: i32, %arg1: i32, %arg2: memref<1x16x1024xf32, #tpu.memory_space<vmem>>, %arg3: memref<1x8x1024xf32, #tpu.memory_space<vmem>>, %arg4: memref<1x8x1024xf32, #tpu.memory_space<vmem>>, %arg5: memref<1024x256xbf16, #tpu.memory_space<vmem>>, %arg6: memref<1x32xf32, #tpu.memory_space<vmem>>, %arg7: memref<7x32x20xf32, #tpu.memory_space<vmem>>, %arg8: memref<1x20xf32, #tpu.memory_space<vmem>>, %arg9: memref<1x16x20xf32, #tpu.memory_space<vmem>>, %arg10: memref<32x256xf32, #tpu.memory_space<vmem>>) attributes {dimension_semantics = [#tpu.dimension_semantics<parallel>, #tpu.dimension_semantics<parallel>], iteration_bounds = array<i64: 2, 3>, scalar_prefetch = 0 : i64, scratch_operands = 1 : i64, tpu.core_type = #tpu.core_type<tc>, window_params = [{transform_indices = @transform_0, window_bounds = array<i64: 1, 16, 1024>}, {transform_indices = @transform_1, window_bounds = array<i64: 1, 8, 1024>}, {transform_indices = @transform_2, window_bounds = array<i64: 1, 8, 1024>}, {pipeline_mode = #tpu.pipeline_mode<synchronous>, transform_indices = @transform_3, window_bounds = array<i64: 1024, 256>}, {pipeline_mode = #tpu.pipeline_mode<synchronous>, transform_indices = @transform_4, window_bounds = array<i64: 1, 32>}, {pipeline_mode = #tpu.pipeline_mode<synchronous>, transform_indices = @transform_5, window_bounds = array<i64: 7, 32, 20>}, {pipeline_mode = #tpu.pipeline_mode<synchronous>, transform_indices = @transform_6, window_bounds = array<i64: 1, 20>}, {transform_indices = @transform_7, window_bounds = array<i64: 1, 16, 20>}]} {
    %c16_i32 = arith.constant 16 : i32
    %0 = arith.muli %arg1, %c16_i32 : i32
    %c0 = arith.constant 0 : index
    %c0_0 = arith.constant 0 : index
    %1 = vector.load %arg5[%c0, %c0_0] : memref<1024x256xbf16, #tpu.memory_space<vmem>>, vector<1024x256xbf16>
    %c0_1 = arith.constant 0 : index
    %c0_2 = arith.constant 0 : index
    %c0_3 = arith.constant 0 : index
    %2 = vector.load %arg3[%c0_1, %c0_2, %c0_3] : memref<1x8x1024xf32, #tpu.memory_space<vmem>>, vector<1x8x1024xf32>
    %3 = vector.shape_cast %2 : vector<1x8x1024xf32> to vector<8x1024xf32>
    %c8_i32 = arith.constant 8 : i32
    %4 = arith.subi %0, %c8_i32 : i32
    %5 = arith.truncf %3 : vector<8x1024xf32> to vector<8x1024xbf16>
    %cst = arith.constant dense<0.000000e+00> : vector<8x256xf32>
    %6 = tpu.matmul %5, %1, %cst {dimension_numbers = #tpu.dot_dimension_numbers<[1], [0], [0], [1], [0, 0, 1, 1], [], []>} : vector<8x1024xbf16>, vector<1024x256xbf16>, vector<8x256xf32> -> vector<8x256xf32>
    %7 = tpu.iota {dimensions = array<i32: 0>} : vector<8x1xi32>
    %8 = vector.broadcast %4 : i32 to vector<8x1xi32>
    %9 = arith.addi %8, %7 : vector<8x1xi32>
    %c0_i32 = arith.constant 0 : i32
    %10 = vector.broadcast %c0_i32 : i32 to vector<8x1xi32>
    %11 = arith.cmpi sge, %9, %10 : vector<8x1xi32>
    %c40_i32 = arith.constant 40 : i32
    %12 = vector.broadcast %c40_i32 : i32 to vector<8x1xi32>
    %13 = arith.cmpi slt, %9, %12 : vector<8x1xi32>
    %14 = arith.andi %11, %13 : vector<8x1xi1>
    %cst_4 = arith.constant 0.000000e+00 : f32
    %15 = vector.shape_cast %14 : vector<8x1xi1> to vector<8x1xi1>
    %16 = vector.broadcast %15 : vector<8x1xi1> to vector<8x256xi1>
    %17 = vector.broadcast %cst_4 : f32 to vector<8x256xf32>
    %18 = arith.select %16, %6, %17 : vector<8x256xi1>, vector<8x256xf32>
    %c0_5 = arith.constant 0 : index
    %c0_6 = arith.constant 0 : index
    %19 = vector.load %arg10[%c0_5, %c0_6] : memref<32x256xf32, #tpu.memory_space<vmem>>, vector<8x256xf32>
    tpu.vector_store %arg10[%c0_5, %c0_6], %18 {strides = array<i32>} : memref<32x256xf32, #tpu.memory_space<vmem>>, vector<8x256xf32>,
    %c0_7 = arith.constant 0 : index
    %c0_8 = arith.constant 0 : index
    %c0_9 = arith.constant 0 : index
    %20 = vector.load %arg2[%c0_7, %c0_8, %c0_9] : memref<1x16x1024xf32, #tpu.memory_space<vmem>>, vector<1x16x1024xf32>
    %21 = vector.shape_cast %20 : vector<1x16x1024xf32> to vector<16x1024xf32>
    %22 = arith.truncf %21 : vector<16x1024xf32> to vector<16x1024xbf16>
    %cst_10 = arith.constant dense<0.000000e+00> : vector<16x256xf32>
    %23 = tpu.matmul %22, %1, %cst_10 {dimension_numbers = #tpu.dot_dimension_numbers<[1], [0], [0], [1], [0, 0, 1, 1], [], []>} : vector<16x1024xbf16>, vector<1024x256xbf16>, vector<16x256xf32> -> vector<16x256xf32>
    %24 = tpu.iota {dimensions = array<i32: 0>} : vector<16x1xi32>
    %25 = vector.broadcast %0 : i32 to vector<16x1xi32>
    %26 = arith.addi %25, %24 : vector<16x1xi32>
    %c0_i32_11 = arith.constant 0 : i32
    %27 = vector.broadcast %c0_i32_11 : i32 to vector<16x1xi32>
    %28 = arith.cmpi sge, %26, %27 : vector<16x1xi32>
    %c40_i32_12 = arith.constant 40 : i32
    %29 = vector.broadcast %c40_i32_12 : i32 to vector<16x1xi32>
    %30 = arith.cmpi slt, %26, %29 : vector<16x1xi32>
    %31 = arith.andi %28, %30 : vector<16x1xi1>
    %cst_13 = arith.constant 0.000000e+00 : f32
    %32 = vector.shape_cast %31 : vector<16x1xi1> to vector<16x1xi1>
    %33 = vector.broadcast %32 : vector<16x1xi1> to vector<16x256xi1>
    %34 = vector.broadcast %cst_13 : f32 to vector<16x256xf32>
    %35 = arith.select %33, %23, %34 : vector<16x256xi1>, vector<16x256xf32>
    %c8 = arith.constant 8 : index
    %c0_14 = arith.constant 0 : index
    %36 = vector.load %arg10[%c8, %c0_14] : memref<32x256xf32, #tpu.memory_space<vmem>>, vector<16x256xf32>
    tpu.vector_store %arg10[%c8, %c0_14], %35 {strides = array<i32>} : memref<32x256xf32, #tpu.memory_space<vmem>>, vector<16x256xf32>,
    %c0_15 = arith.constant 0 : index
    %c0_16 = arith.constant 0 : index
    %c0_17 = arith.constant 0 : index
    %37 = vector.load %arg4[%c0_15, %c0_16, %c0_17] : memref<1x8x1024xf32, #tpu.memory_space<vmem>>, vector<1x8x1024xf32>
    %38 = vector.shape_cast %37 : vector<1x8x1024xf32> to vector<8x1024xf32>
    %c16_i32_18 = arith.constant 16 : i32
    %39 = arith.addi %0, %c16_i32_18 : i32
    %40 = arith.truncf %38 : vector<8x1024xf32> to vector<8x1024xbf16>
    %cst_19 = arith.constant dense<0.000000e+00> : vector<8x256xf32>
    %41 = tpu.matmul %40, %1, %cst_19 {dimension_numbers = #tpu.dot_dimension_numbers<[1], [0], [0], [1], [0, 0, 1, 1], [], []>} : vector<8x1024xbf16>, vector<1024x256xbf16>, vector<8x256xf32> -> vector<8x256xf32>
    %42 = tpu.iota {dimensions = array<i32: 0>} : vector<8x1xi32>
    %43 = vector.broadcast %39 : i32 to vector<8x1xi32>
    %44 = arith.addi %43, %42 : vector<8x1xi32>
    %c0_i32_20 = arith.constant 0 : i32
    %45 = vector.broadcast %c0_i32_20 : i32 to vector<8x1xi32>
    %46 = arith.cmpi sge, %44, %45 : vector<8x1xi32>
    %c40_i32_21 = arith.constant 40 : i32
    %47 = vector.broadcast %c40_i32_21 : i32 to vector<8x1xi32>
    %48 = arith.cmpi slt, %44, %47 : vector<8x1xi32>
    %49 = arith.andi %46, %48 : vector<8x1xi1>
    %cst_22 = arith.constant 0.000000e+00 : f32
    %50 = vector.shape_cast %49 : vector<8x1xi1> to vector<8x1xi1>
    %51 = vector.broadcast %50 : vector<8x1xi1> to vector<8x256xi1>
    %52 = vector.broadcast %cst_22 : f32 to vector<8x256xf32>
    %53 = arith.select %51, %41, %52 : vector<8x256xi1>, vector<8x256xf32>
    %c24 = arith.constant 24 : index
    %c0_23 = arith.constant 0 : index
    %54 = vector.load %arg10[%c24, %c0_23] : memref<32x256xf32, #tpu.memory_space<vmem>>, vector<8x256xf32>
    tpu.vector_store %arg10[%c24, %c0_23], %53 {strides = array<i32>} : memref<32x256xf32, #tpu.memory_space<vmem>>, vector<8x256xf32>,
    %cst_24 = arith.constant 0.000000e+00 : f32
    %55 = vector.broadcast %cst_24 : f32 to vector<24x32xf32>
    %c1 = arith.constant 1 : index
    %c0_25 = arith.constant 0 : index
    %56 = vector.load %arg10[%c1, %c0_25] : memref<32x256xf32, #tpu.memory_space<vmem>>, vector<24x32xf32>
    %57 = arith.addf %55, %56 : vector<24x32xf32>
    %c2 = arith.constant 2 : index
    %c32 = arith.constant 32 : index
    %58 = vector.load %arg10[%c2, %c32] : memref<32x256xf32, #tpu.memory_space<vmem>>, vector<24x32xf32>
    %59 = arith.addf %57, %58 : vector<24x32xf32>
    %c3 = arith.constant 3 : index
    %c64 = arith.constant 64 : index
    %60 = vector.load %arg10[%c3, %c64] : memref<32x256xf32, #tpu.memory_space<vmem>>, vector<24x32xf32>
    %61 = arith.addf %59, %60 : vector<24x32xf32>
    %c4 = arith.constant 4 : index
    %c96 = arith.constant 96 : index
    %62 = vector.load %arg10[%c4, %c96] : memref<32x256xf32, #tpu.memory_space<vmem>>, vector<24x32xf32>
    %63 = arith.addf %61, %62 : vector<24x32xf32>
    %c5 = arith.constant 5 : index
    %c128 = arith.constant 128 : index
    %64 = vector.load %arg10[%c5, %c128] : memref<32x256xf32, #tpu.memory_space<vmem>>, vector<24x32xf32>
    %65 = arith.addf %63, %64 : vector<24x32xf32>
    %c6 = arith.constant 6 : index
    %c160 = arith.constant 160 : index
    %66 = vector.load %arg10[%c6, %c160] : memref<32x256xf32, #tpu.memory_space<vmem>>, vector<24x32xf32>
    %67 = arith.addf %65, %66 : vector<24x32xf32>
    %c7 = arith.constant 7 : index
    %c192 = arith.constant 192 : index
    %68 = vector.load %arg10[%c7, %c192] : memref<32x256xf32, #tpu.memory_space<vmem>>, vector<24x32xf32>
    %69 = arith.addf %67, %68 : vector<24x32xf32>
    %c0_26 = arith.constant 0 : index
    %c0_27 = arith.constant 0 : index
    %70 = vector.load %arg6[%c0_26, %c0_27] : memref<1x32xf32, #tpu.memory_space<vmem>>, vector<1x32xf32>
    %71 = vector.broadcast %70 : vector<1x32xf32> to vector<24x32xf32>
    %72 = arith.addf %69, %71 : vector<24x32xf32>
    %cst_28 = arith.constant 0.000000e+00 : f32
    %73 = vector.broadcast %cst_28 : f32 to vector<24x32xf32>
    %74 = arith.maximumf %72, %73 : vector<24x32xf32>
    %c4_i32 = arith.constant 4 : i32
    %75 = arith.subi %0, %c4_i32 : i32
    %76 = tpu.iota {dimensions = array<i32: 0>} : vector<24x1xi32>
    %77 = vector.broadcast %75 : i32 to vector<24x1xi32>
    %78 = arith.addi %77, %76 : vector<24x1xi32>
    %c0_i32_29 = arith.constant 0 : i32
    %79 = vector.broadcast %c0_i32_29 : i32 to vector<24x1xi32>
    %80 = arith.cmpi sge, %78, %79 : vector<24x1xi32>
    %c40_i32_30 = arith.constant 40 : i32
    %81 = vector.broadcast %c40_i32_30 : i32 to vector<24x1xi32>
    %82 = arith.cmpi slt, %78, %81 : vector<24x1xi32>
    %83 = arith.andi %80, %82 : vector<24x1xi1>
    %cst_31 = arith.constant 0.000000e+00 : f32
    %84 = vector.shape_cast %83 : vector<24x1xi1> to vector<24x1xi1>
    %85 = vector.broadcast %84 : vector<24x1xi1> to vector<24x32xi1>
    %86 = vector.broadcast %cst_31 : f32 to vector<24x32xf32>
    %87 = arith.select %85, %74, %86 : vector<24x32xi1>, vector<24x32xf32>
    %c0_32 = arith.constant 0 : index
    %c0_33 = arith.constant 0 : index
    %c0_34 = arith.constant 0 : index
    %88 = vector.load %arg7[%c0_32, %c0_33, %c0_34] : memref<7x32x20xf32, #tpu.memory_space<vmem>>, vector<7x32x20xf32>
    %cst_35 = arith.constant 0.000000e+00 : f32
    %89 = vector.broadcast %cst_35 : f32 to vector<16x20xf32>
    %90 = vector.extract_strided_slice %87 {offsets = [1, 0], sizes = [16, 32], strides = [1, 1]} : vector<24x32xf32> to vector<16x32xf32>
    %91 = vector.extract_strided_slice %88 {offsets = [0, 0, 0], sizes = [1, 32, 20], strides = [1, 1, 1]} : vector<7x32x20xf32> to vector<1x32x20xf32>
    %92 = vector.shape_cast %91 : vector<1x32x20xf32> to vector<32x20xf32>
    %cst_36 = arith.constant dense<0.000000e+00> : vector<16x20xf32>
    %93 = tpu.matmul %90, %92, %cst_36 {dimension_numbers = #tpu.dot_dimension_numbers<[1], [0], [0], [1], [0, 0, 1, 1], [], []>} : vector<16x32xf32>, vector<32x20xf32>, vector<16x20xf32> -> vector<16x20xf32>
    %94 = arith.addf %89, %93 : vector<16x20xf32>
    %95 = vector.extract_strided_slice %87 {offsets = [2, 0], sizes = [16, 32], strides = [1, 1]} : vector<24x32xf32> to vector<16x32xf32>
    %96 = vector.extract_strided_slice %88 {offsets = [1, 0, 0], sizes = [1, 32, 20], strides = [1, 1, 1]} : vector<7x32x20xf32> to vector<1x32x20xf32>
    %97 = vector.shape_cast %96 : vector<1x32x20xf32> to vector<32x20xf32>
    %cst_37 = arith.constant dense<0.000000e+00> : vector<16x20xf32>
    %98 = tpu.matmul %95, %97, %cst_37 {dimension_numbers = #tpu.dot_dimension_numbers<[1], [0], [0], [1], [0, 0, 1, 1], [], []>} : vector<16x32xf32>, vector<32x20xf32>, vector<16x20xf32> -> vector<16x20xf32>
    %99 = arith.addf %94, %98 : vector<16x20xf32>
    %100 = vector.extract_strided_slice %87 {offsets = [3, 0], sizes = [16, 32], strides = [1, 1]} : vector<24x32xf32> to vector<16x32xf32>
    %101 = vector.extract_strided_slice %88 {offsets = [2, 0, 0], sizes = [1, 32, 20], strides = [1, 1, 1]} : vector<7x32x20xf32> to vector<1x32x20xf32>
    %102 = vector.shape_cast %101 : vector<1x32x20xf32> to vector<32x20xf32>
    %cst_38 = arith.constant dense<0.000000e+00> : vector<16x20xf32>
    %103 = tpu.matmul %100, %102, %cst_38 {dimension_numbers = #tpu.dot_dimension_numbers<[1], [0], [0], [1], [0, 0, 1, 1], [], []>} : vector<16x32xf32>, vector<32x20xf32>, vector<16x20xf32> -> vector<16x20xf32>
    %104 = arith.addf %99, %103 : vector<16x20xf32>
    %105 = vector.extract_strided_slice %87 {offsets = [4, 0], sizes = [16, 32], strides = [1, 1]} : vector<24x32xf32> to vector<16x32xf32>
    %106 = vector.extract_strided_slice %88 {offsets = [3, 0, 0], sizes = [1, 32, 20], strides = [1, 1, 1]} : vector<7x32x20xf32> to vector<1x32x20xf32>
    %107 = vector.shape_cast %106 : vector<1x32x20xf32> to vector<32x20xf32>
    %cst_39 = arith.constant dense<0.000000e+00> : vector<16x20xf32>
    %108 = tpu.matmul %105, %107, %cst_39 {dimension_numbers = #tpu.dot_dimension_numbers<[1], [0], [0], [1], [0, 0, 1, 1], [], []>} : vector<16x32xf32>, vector<32x20xf32>, vector<16x20xf32> -> vector<16x20xf32>
    %109 = arith.addf %104, %108 : vector<16x20xf32>
    %110 = vector.extract_strided_slice %87 {offsets = [5, 0], sizes = [16, 32], strides = [1, 1]} : vector<24x32xf32> to vector<16x32xf32>
    %111 = vector.extract_strided_slice %88 {offsets = [4, 0, 0], sizes = [1, 32, 20], strides = [1, 1, 1]} : vector<7x32x20xf32> to vector<1x32x20xf32>
    %112 = vector.shape_cast %111 : vector<1x32x20xf32> to vector<32x20xf32>
    %cst_40 = arith.constant dense<0.000000e+00> : vector<16x20xf32>
    %113 = tpu.matmul %110, %112, %cst_40 {dimension_numbers = #tpu.dot_dimension_numbers<[1], [0], [0], [1], [0, 0, 1, 1], [], []>} : vector<16x32xf32>, vector<32x20xf32>, vector<16x20xf32> -> vector<16x20xf32>
    %114 = arith.addf %109, %113 : vector<16x20xf32>
    %115 = vector.extract_strided_slice %87 {offsets = [6, 0], sizes = [16, 32], strides = [1, 1]} : vector<24x32xf32> to vector<16x32xf32>
    %116 = vector.extract_strided_slice %88 {offsets = [5, 0, 0], sizes = [1, 32, 20], strides = [1, 1, 1]} : vector<7x32x20xf32> to vector<1x32x20xf32>
    %117 = vector.shape_cast %116 : vector<1x32x20xf32> to vector<32x20xf32>
    %cst_41 = arith.constant dense<0.000000e+00> : vector<16x20xf32>
    %118 = tpu.matmul %115, %117, %cst_41 {dimension_numbers = #tpu.dot_dimension_numbers<[1], [0], [0], [1], [0, 0, 1, 1], [], []>} : vector<16x32xf32>, vector<32x20xf32>, vector<16x20xf32> -> vector<16x20xf32>
    %119 = arith.addf %114, %118 : vector<16x20xf32>
    %120 = vector.extract_strided_slice %87 {offsets = [7, 0], sizes = [16, 32], strides = [1, 1]} : vector<24x32xf32> to vector<16x32xf32>
    %121 = vector.extract_strided_slice %88 {offsets = [6, 0, 0], sizes = [1, 32, 20], strides = [1, 1, 1]} : vector<7x32x20xf32> to vector<1x32x20xf32>
    %122 = vector.shape_cast %121 : vector<1x32x20xf32> to vector<32x20xf32>
    %cst_42 = arith.constant dense<0.000000e+00> : vector<16x20xf32>
    %123 = tpu.matmul %120, %122, %cst_42 {dimension_numbers = #tpu.dot_dimension_numbers<[1], [0], [0], [1], [0, 0, 1, 1], [], []>} : vector<16x32xf32>, vector<32x20xf32>, vector<16x20xf32> -> vector<16x20xf32>
    %124 = arith.addf %119, %123 : vector<16x20xf32>
    %c0_43 = arith.constant 0 : index
    %c0_44 = arith.constant 0 : index
    %125 = vector.load %arg8[%c0_43, %c0_44] : memref<1x20xf32, #tpu.memory_space<vmem>>, vector<1x20xf32>
    %126 = vector.broadcast %125 : vector<1x20xf32> to vector<16x20xf32>
    %127 = arith.addf %124, %126 : vector<16x20xf32>
    %cst_45 = arith.constant dense<0xFF800000> : vector<16xf32>
    %128 = vector.multi_reduction <maximumf>, %127, %cst_45 [1] : vector<16x20xf32> to vector<16xf32>
    %129 = vector.shape_cast %128 : vector<16xf32> to vector<16x1xf32>
    %130 = vector.broadcast %129 : vector<16x1xf32> to vector<16x20xf32>
    %131 = arith.subf %127, %130 : vector<16x20xf32>
    %132 = math.exp %131 : vector<16x20xf32>
    %cst_46 = arith.constant dense<0.000000e+00> : vector<16xf32>
    %133 = vector.multi_reduction <add>, %132, %cst_46 [1] : vector<16x20xf32> to vector<16xf32>
    %134 = vector.shape_cast %133 : vector<16xf32> to vector<16x1xf32>
    %135 = vector.broadcast %134 : vector<16x1xf32> to vector<16x20xf32>
    %136 = arith.divf %132, %135 : vector<16x20xf32>
    %c0_47 = arith.constant 0 : index
    %c0_48 = arith.constant 0 : index
    %c0_49 = arith.constant 0 : index
    %137 = vector.load %arg9[%c0_47, %c0_48, %c0_49] : memref<1x16x20xf32, #tpu.memory_space<vmem>>, vector<1x16x20xf32>
    %138 = vector.shape_cast %137 : vector<1x16x20xf32> to vector<16x20xf32>
    %139 = vector.shape_cast %136 : vector<16x20xf32> to vector<1x16x20xf32>
    tpu.vector_store %arg9[%c0_47, %c0_48, %c0_49], %139 {strides = array<i32>} : memref<1x16x20xf32, #tpu.memory_space<vmem>>, vector<1x16x20xf32>,
    return
  }
  func.func @transform_0(%arg0: i32, %arg1: i32) -> (i32, i32, i32) {
    %c0_i32 = arith.constant 0 : i32
    %c0_i32_0 = arith.constant 0 : i32
    return %arg0, %arg1, %c0_i32 : i32, i32, i32
  }
  func.func @transform_1(%arg0: i32, %arg1: i32) -> (i32, i32, i32) {
    %c2_i32 = arith.constant 2 : i32
    %0 = arith.muli %arg1, %c2_i32 : i32
    %c1_i32 = arith.constant 1 : i32
    %1 = arith.subi %0, %c1_i32 : i32
    %c0_i32 = arith.constant 0 : i32
    %2 = arith.maxsi %1, %c0_i32 : i32
    %c4_i32 = arith.constant 4 : i32
    %3 = arith.minsi %2, %c4_i32 : i32
    %c0_i32_0 = arith.constant 0 : i32
    %c0_i32_1 = arith.constant 0 : i32
    return %arg0, %3, %c0_i32_0 : i32, i32, i32
  }
  func.func @transform_2(%arg0: i32, %arg1: i32) -> (i32, i32, i32) {
    %c1_i32 = arith.constant 1 : i32
    %0 = arith.addi %arg1, %c1_i32 : i32
    %c2_i32 = arith.constant 2 : i32
    %1 = arith.muli %0, %c2_i32 : i32
    %c4_i32 = arith.constant 4 : i32
    %2 = arith.minsi %1, %c4_i32 : i32
    %c0_i32 = arith.constant 0 : i32
    %c0_i32_0 = arith.constant 0 : i32
    return %arg0, %2, %c0_i32 : i32, i32, i32
  }
  func.func @transform_3(%arg0: i32, %arg1: i32) -> (i32, i32) {
    %c0_i32 = arith.constant 0 : i32
    %c0_i32_0 = arith.constant 0 : i32
    %c0_i32_1 = arith.constant 0 : i32
    return %c0_i32, %c0_i32_0 : i32, i32
  }
  func.func @transform_4(%arg0: i32, %arg1: i32) -> (i32, i32) {
    %c0_i32 = arith.constant 0 : i32
    %c0_i32_0 = arith.constant 0 : i32
    %c0_i32_1 = arith.constant 0 : i32
    return %c0_i32, %c0_i32_0 : i32, i32
  }
  func.func @transform_5(%arg0: i32, %arg1: i32) -> (i32, i32, i32) {
    %c0_i32 = arith.constant 0 : i32
    %c0_i32_0 = arith.constant 0 : i32
    %c0_i32_1 = arith.constant 0 : i32
    %c0_i32_2 = arith.constant 0 : i32
    return %c0_i32, %c0_i32_0, %c0_i32_1 : i32, i32, i32
  }
  func.func @transform_6(%arg0: i32, %arg1: i32) -> (i32, i32) {
    %c0_i32 = arith.constant 0 : i32
    %c0_i32_0 = arith.constant 0 : i32
    %c0_i32_1 = arith.constant 0 : i32
    return %c0_i32, %c0_i32_0 : i32, i32
  }
  func.func @transform_7(%arg0: i32, %arg1: i32) -> (i32, i32, i32) {
    %c0_i32 = arith.constant 0 : i32
    %c0_i32_0 = arith.constant 0 : i32
    return %arg0, %arg1, %c0_i32 : i32, i32, i32
  }
}

</mosaic_0001>

<bundles_post_ra>
// kernel: tpu_custom_call.1
= control target key start
LH: loop header
LB: loop body
LE: loop exit
PB: predicated region body
PF: predicated region fallthrough
CT: control target
= control target key end

     0   :  { %s5558_s0 = inlined_call_operand.hbm [shape: f32[2,40,1024], index: 0, kind: input, shape index: {}]   ;;  %s5559_s1 = inlined_call_operand.hbm [shape: f32[2,40,1024], index: 1, kind: input, shape index: {}]   ;;  %s5560_s2 = inlined_call_operand.hbm [shape: f32[2,40,1024], index: 2, kind: input, shape index: {}]   ;;  %s5561_s3 = inlined_call_operand.hbm [shape: bf16[1024,256], index: 3, kind: input, shape index: {}]   ;;  %s5562_s4 = inlined_call_operand.vmem [shape: f32[1,32], index: 4, kind: input, shape index: {}]   ;;  %s5563_s5 = inlined_call_operand.vmem [shape: f32[7,32,20], index: 5, kind: input, shape index: {}]   ;;  %s5564_s6 = inlined_call_operand.vmem [shape: f32[1,20], index: 6, kind: input, shape index: {}]   ;;  %s5565_s7 = inlined_call_operand.vmem [shape: f32[2,40,20], index: 7, kind: output, shape index: {}]  }
   0x1   :  { %5702 = sst [smem:[#allocation86_spill]] %s5561_s3 }
   0x2   :  { %5703 = sst [smem:[#allocation87_spill]] %s5562_s4 }
   0x3   :  { %5704 = sst [smem:[#allocation88_spill]] %s5563_s5 }
   0x4   :  { %5705 = sst [smem:[#allocation89_spill]] %s5564_s6 }
   0x5   :  { %5706 = sst [smem:[#allocation90_spill]] %s5565_s7 }
   0x6   :  { %12 = vsyncpa [#allocation4], 0 }
   0x7   :  { %14 = vsyncpa [#allocation4 + $0x1], 0 }
   0x8   :  { %15 = vsyncpa [#allocation6], 0 }
   0x9   :  { %17 = vsyncpa [#allocation6 + $0x1], 0 }
   0xa   :  { %18 = vsyncpa [#allocation9], 0  ;;  %s4262_s24 = smov 0   ;;  %s4264_s25 = smov 0  }
   0xb   :  { %s4266_s26 = smov 0   ;;  %s4268_s27 = smov 0  }
   0xc   :  { %s4270_s28 = smov 0   ;;  %s4272_s29 = smov 0  }
   0xd   :  { %s4274_s30 = smov 0   ;;  %s4276_s8 = smov 0  }
   0xe   :  { %s4278_s9 = smov 0   ;;  %s4280_s10 = smov 0  }
   0xf   :  { %s4282_s11 = smov 0   ;;  %s4284_s12 = smov 0  }
  0x10   :  { %s4286_s13 = smov 0   ;;  %s4288_s14 = smov 0  }
  0x11 LB: > { %5707 = sst [smem:[#allocation15_spill]] %s4129_s25  ;;  %s4331_s15 = sadd.s32 4294967295, %s4177_s14   ;;  %s4177_s14 = sphi %s4288_s14, %s24_s14   ;;  %s4173_s13 = sphi %s4286_s13, %s5900_s13   ;;  %s4169_s12 = sphi %s4284_s12, %s5899_s12   ;;  %s4165_s11 = sphi %s4282_s11, %s5898_s11   ;;  %s4161_s10 = sphi %s4280_s10, %s5897_s10   ;;  %s4157_s9 = sphi %s4278_s9, %s5896_s9   ;;  %s4153_s8 = sphi %s4276_s8, %s5895_s8   ;;  %s4149_s30 = sphi %s4274_s30, %s5894_s30   ;;  %s4145_s29 = sphi %s4272_s29, %s5893_s29   ;;  %s4141_s28 = sphi %s4270_s28, %s5892_s28   ;;  %s4137_s27 = sphi %s4268_s27, %s5885_s27   ;;  %s4133_s26 = sphi %s4266_s26, %s5891_s26   ;;  %s4129_s25 = sphi %s4264_s25, %s5890_s25   ;;  %s4125_s24 = sphi %s4262_s24, %s5883_s24  }
  0x12   : > { %5708 = sst [smem:[#allocation16_spill]] %s4141_s28  ;;  %s33_s16 = sadd.s32 1, %s4169_s12 }
  0x13   : > { %5709 = sst [smem:[#allocation17_spill]] %s4161_s10  ;;  %p34_p0 = scmp.ge.s32.totalorder %s33_s16, 3 }
  0x14   : > { %5710 = sst [smem:[#allocation18_spill]] %s4165_s11  ;;  %s36_s17 = sadd.s32 1, %s4173_s13 }
  0x15   : > { %s45_s18 = sadd.s32 1, %s4157_s9  ;;  %p5569_p1 = scmp.ne.s32.totalorder %s4157_s9, %s4153_s8 }
  0x16   : > { %s5902_s16 = smov (%p34_p0, %s33_s16), 0  ;;  %s5904_s17 = smov (!%p34_p0, %s36_s17), %s4173_s13 }
  0x17   : > { %5711 = sst [smem:[#allocation19_spill]] %s5902_s16  ;;  %s41_s19 = ssub.s32 %s4169_s12, %s5902_s16 }
  0x18   : > { %p53_p2 = scmp.eq.s32.totalorder %s4177_s14, 0  ;;  %p38_p3 = scmp.ge.s32.totalorder %s5904_s17, 2 }
  0x19   : > { %p58_p4 = scmp.ne.s32.totalorder %s4153_s8, %s4149_s30  ;;  %p5578_p6 = scmp.eq.s32.totalorder %s4331_s15, 0 }
  0x1a   : > { %p4350_p5 = por %p53_p2, %p5569_p1  ;;  %s5906_s17 = smov (%p38_p3, %s5904_s17), 0 }
  0x1b   : > { %5713 = sst [smem:[#allocation20_spill]] %s5906_s17  ;;  %p4359_p7 = por %p5578_p6, %p58_p4 }
  0x1c   : > { %s5712_s20 = scalar_select %p4350_p5, 1, 0 }
  0x1d   : > { %s5714_s21 = scalar_select %p4359_p7, 1, 0 }
  0x1e   : > { %s4364_s22 = sshll.u32 %s4169_s12, 1  ;;  %s4368_s23 = ssub.s32 %s4173_s13, %s5906_s17 }
  0x1f   : > { %s3042_s30 = sadd.s32 4294967295, %s4364_s22  ;;  %s42_s7 = sor.u32 %s41_s19, %s4368_s23 }
  0x20   : > { %p70_p8 = scmp.gt.s32.totalorder %s3042_s30, 0  ;;  %p43_p9 = scmp.eq.s32.totalorder %s42_s7, 0 }
  0x21   : > { %s3048_s6 = sshll.u32 %s5902_s16, 1  ;;  %s85_s4 = sadd.s32 1, %s4145_s29 }
  0x22   : > { %s5908_s30 = smov (!%p70_p8, %s3042_s30), 0  ;;  %s3049_s5 = sadd.s32 4294967295, %s3048_s6 }
  0x23   : > { %s4375_s11 = scalar_select %p43_p9, %s4157_s9, %s45_s18  }
  0x24   : > { %p92_p10 = scmp.ne.s32.totalorder %s4145_s29, %s4141_s28  ;;  %p76_p11 = scmp.gt.s32.totalorder %s3049_s5, 0 }
  0x25   : > { %5715 = sst [smem:[#allocation21_spill]] %s4375_s11  ;;  %p98_p13 = scmp.ne.s32.totalorder %s4141_s28, %s4137_s27 }
  0x26   : > { %p4383_p12 = por %p92_p10, %p53_p2  ;;  %s5910_s5 = smov (!%p76_p11, %s3049_s5), 0 }
  0x27   : > { %p4391_p0 = por %p98_p13, %p5578_p6  ;;  %s3258_s18 = sadd.s32 2, %s4364_s22 }
  0x28   : > { %s5716_s19 = scalar_select %p4383_p12, 1, 0 }
  0x29   : > { %s5717_s7 = scalar_select %p4391_p0, 1, 0 }
  0x2a   : > { %p110_p3 = scmp.lt.s32.totalorder %s3258_s18, 4  ;;  %s3260_s17 = sadd.s32 2, %s3048_s6 }
  0x2b   : > { %5718 = sst [smem:[#allocation22_spill]] %s5717_s7  ;;  %s81_s16 = ssub.s32 %s5908_s30, %s5910_s5 }
  0x2c   : > { %p114_p4 = scmp.lt.s32.totalorder %s3260_s17, 4  ;;  %s82_s27 = sor.u32 %s81_s16, %s4368_s23 }
  0x2d   : > { %s121_s11 = sadd.s32 1, %s4133_s26  ;;  %p83_p8 = scmp.eq.s32.totalorder %s82_s27, 0 }
  0x2e   : > { %p128_p9 = scmp.ne.s32.totalorder %s4133_s26, %s4129_s25  ;;  %s5912_s18 = smov (!%p110_p3, %s3258_s18), 4 }
  0x2f   : > { %s4404_s10 = scalar_select %p83_p8, %s4145_s29, %s85_s4  }
  0x30   : > { %s5914_s17 = smov (!%p114_p4, %s3260_s17), 4  ;;  %p4408_p10 = por %p128_p9, %p53_p2 }
  0x31   : > { %5719 = sst [smem:[#allocation23_spill]] %s4404_s10  ;;  %p134_p11 = scmp.ne.s32.totalorder %s4129_s25, %s4125_s24 }
  0x32   : > { %s5720_s6 = scalar_select %p4408_p10, 1, 0 }
  0x33   : > { %s117_s5 = ssub.s32 %s5912_s18, %s5914_s17  ;;  %p244_p13 = scmp.eq.s32.totalorder %s4331_s15, 5 }
  0x34   : > { %s118_s16 = sor.u32 %s117_s5, %s4368_s23  ;;  %p4419_p1 = por %p134_p11, %p5578_p6 }
  0x35   : > { %p119_p3 = scmp.eq.s32.totalorder %s118_s16, 0  ;;  %p5723_p0 = scmp.ne.s32.totalorder %s4157_s9, %s4153_s8 }
  0x36   : > { %s5721_s27 = scalar_select %p4419_p1, 1, 0 }
  0x37   : > { %p4426_p8 = por %p244_p13, %p5723_p0  ;;  %p3057_p2 = scmp.ge.s32.totalorder %s4177_s14, 1 }
  0x38   : > { %5722 = sst [smem:[#allocation24_spill]] %s5721_s27  ;;  %p257_p4 = scmp.lt.s32.totalorder %s4177_s14, 7 }
  0x39   : > { %s5724_s4 = scalar_select %p4426_p8, 1, 0 }
  0x3a   : > { %s4433_s10 = scalar_select %p119_p3, %s4133_s26, %s121_s11  }
  0x3b   : > { %5725 = sst [smem:[#allocation25_spill]] %s5724_s4  ;;  %p4435_p9 = pnand %p3057_p2, %p257_p4 }
  0x3c   : > { %5726 = sst [smem:[#allocation26_spill]] %s4433_s10  ;;  %s4211_s17 = smov [#allocation8]  }
  0x3d   : > { %s5727_s24 = scalar_select %p4435_p9, 1, 0 }
  0x3e   : > { %p3503_p11 = pneg %p4435_p9  ;;  %s269_s23 = sshll.u32 %s4211_s17, 4  ;;  %s270_s23 = int_to_ptr.vmem [resolvable:$true] %s269_s23 }
  0x3f   : > { %s5729_s3 = sld [smem:[#allocation86_spill]] }
  0x40   : > { %p4443_p1 = pnand %p3503_p11, %p5578_p6 }
  0x42   : > { %p3909_p13 = pneg %p4443_p1 }
  0x45   : > { %s3907_s11 = scalar_lea.hbm %s5729_s3, 16384 }
  0x46   : > { %p3908_p0 = scmp.ne.s32.totalorder %s5729_s3, %s3907_s11  ;;  %p3914_p4 = scmp.lt.u32.totalorder %s3907_s11, %s5729_s3 }
  0x48   : > { %p3910_p3 = pnand %p3909_p13, %p3908_p0 }
  0x4a   : > { %p3911_p2 = pneg %p3910_p3 }
  0x4c   : > { %p3916_p11 = pnand %p3914_p4, %p3911_p2 }
  0x4e   : > { %3919 = shalt.err (!%p3916_p11)
}
  0x4f   : > { %s3920_s7 = scalar_lea.vmem %s270_s23, 16384  ;;  %p3928_p9 = scmp.lt.s32.totalorder %s270_s23, %s270_s23 }
  0x50   : > { %p3921_p6 = scmp.ne.s32.totalorder %s270_s23, %s3920_s7  ;;  %p3929_p10 = scmp.lt.s32.totalorder %s3920_s7, %s3920_s7 }
  0x52   : > { %p3923_p8 = pnand %p3921_p6, %p3909_p13  ;;  %p3930_p12 = por %p3929_p10, %p3928_p9 }
  0x54   : > { %p3924_p7 = pneg %p3923_p8 }
  0x56   : > { %p3931_p5 = pnand %p3930_p12, %p3924_p7 }
  0x58   : > { %3934 = shalt.err (!%p3931_p5)
}
  0x59   : > { %s4212_s10 = smov 128   ;;  %s4213_s27 = smov 8  }
  0x5a   : > { %3506 = dma.hbm_to_vmem [thread:$0]  (!%p4443_p1), %s5729_s3, 16384, %s270_s23, [#allocation9], %s4212_s10, %s4212_s10, %s4213_s27  }
  0x5b   : > { %p3059_p0 = scmp.ge.s32.totalorder %s4177_s14, 6 }
  0x5c   : > { %p5730_p3 = scmp.ne.s32.totalorder (!%p3059_p0), %s5712_s20, 0 }
  0x5d   : > { %288 = sbr.rel (%p3059_p0) target bundleno = 192 (0xc0), region = 32 }
  0x64   : > { %291 = sbr.rel (!%p5730_p3) target bundleno = 138 (0x8a), region = 36  ;;  %s292_s25 = sand.u32 (%p5730_p3), 1, %s4157_s9  }
  0x65   : > { %s298_s7 = ssub.s32 (%p5730_p3), 5, %s4364_s22  ;;  %s3060_s11 = sshll.u32 (%p5730_p3), %s292_s25, 7 }
  0x66   : > { %p299_p5 = scmp.lt.s32.totalorder (%p5730_p3), %s298_s7, 2  ;;  %s4471_s28 = scalar_lea.sflag (%p5730_p3), [#allocation4], %s292_s25 }
  0x67   : > { %s296_s23 = scalar_lea.vmem (%p5730_p3), [#allocation3], %s3060_s11 }
  0x6b   : > { %s5916_s7 = smov (!%p299_p5, %s298_s7), 2 }
  0x6c   : > { %s4468_s17 = sshll.u32 %s5916_s7, 10 }
  0x6d   : > { %s304_s5 = ssub.s32 2048, %s4468_s17 }
  0x6e   : > { %305 = vsyncadd %s4471_s28, %s304_s5  ;;  %p3064_p1 = scmp.ne.s32.totalorder %s4468_s17, 0  ;;  %s3262_s20 = sshll.u32 %s4169_s12, 4 }
  0x6f   : > { %s3490_s22 = smul.u32 40, %s4173_s13  ;;  %s313_s10 = sshll.u32 %s296_s23, 4  ;;  %s4477_s10 = int_to_ptr.vmem [resolvable:$true] %s313_s10 }
  0x70   : > { %s3939_s3 = scalar_lea.hbm %s5558_s0, 10240 }
  0x71   : > { %s309_s27 = sadd.s32 %s3490_s22, %s3262_s20 }
  0x72   : > { %s3066_s4 = sshll.u32 %s309_s27, 7 }
  0x73   : > { %s4482_s25 = scalar_lea.hbm %s5558_s0, %s3066_s4 }
  0x74   : > { %s3935_s11 = scalar_lea.hbm %s4482_s25, %s4468_s17  ;;  %p3940_p10 = scmp.lt.u32.totalorder %s4482_s25, %s5558_s0 }
  0x75   : > { %p3936_p6 = scmp.ne.s32.totalorder %s4482_s25, %s3935_s11  ;;  %p3941_p8 = scmp.lt.u32.totalorder %s3939_s3, %s3935_s11 }
  0x76   : > { %p3943_p13 = scmp.lt.u32.totalorder %s3935_s11, %s4482_s25 }
  0x77   : > { %p3937_p7 = pnand %p3936_p6, %p3064_p1  ;;  %p3942_p9 = por %p3941_p8, %p3940_p10 }
  0x79   : > { %p3938_p12 = pneg %p3937_p7  ;;  %p3944_p2 = por %p3943_p13, %p3942_p9 }
  0x7b   : > { %p3945_p4 = pnand %p3944_p2, %p3938_p12 }
  0x7d   : > { %3948 = shalt.err (!%p3945_p4)
}
  0x7e   : > { %s3949_s27 = scalar_lea.vmem %s4477_s10, %s4468_s17  ;;  %s4214_s4 = smov [#allocation3]  }
  0x7f   : > { %p3950_p11 = scmp.ne.s32.totalorder %s4477_s10, %s3949_s27  ;;  %s3953_s16 = sshll.u32 %s4214_s4, 4  ;;  %s3954_s16 = int_to_ptr.vmem [resolvable:$false] %s3953_s16 }
  0x80   : > { %s3955_s7 = scalar_lea.vmem %s3954_s16, 4096  ;;  %p3956_p5 = scmp.lt.s32.totalorder %s4477_s10, %s3954_s16 }
  0x81   : > { %p3951_p0 = pnand %p3950_p11, %p3064_p1  ;;  %p3957_p6 = scmp.lt.s32.totalorder %s3955_s7, %s3949_s27 }
  0x83   : > { %p3952_p3 = pneg %p3951_p0  ;;  %p3958_p7 = por %p3957_p6, %p3956_p5 }
  0x85   : > { %p3959_p10 = pnand %p3958_p7, %p3952_p3 }
  0x87   : > { %3962 = shalt.err (!%p3959_p10)
}
  0x88   : > { %s4215_s3 = smov 1024   ;;  %s4216_s11 = smov 64  }
  0x89   : > { %319 = dma.hbm_to_vmem [thread:$0]  (%p3064_p1), %s4482_s25, %s4468_s17, %s4477_s10, %s4471_s28, %s4215_s3, %s4215_s3, %s4216_s11  }
  0x8a PF: > { %s323_s5 = sand.u32 1, %s4177_s14   ;;  %s325_s23 = sand.u32 1, %s4145_s29  }
  0x8b   : > { %s3069_s20 = sshll.u32 %s325_s23, 6  ;;  %s3077_s22 = sshll.u32 %s5908_s30, 3 }
  0x8c   : > { %s3491_s27 = smul.u32 40, %s4173_s13  ;;  %s327_s4 = scalar_lea.vmem [#allocation5], %s3069_s20 }
  0x8d   : > { %s343_s16 = sshll.u32 %s327_s4, 4  ;;  %s352_s7 = sand.u32 1, %s4133_s26   ;;  %s4513_s16 = int_to_ptr.vmem [resolvable:$true] %s343_s16 }
  0x8e   : > { %s339_s28 = sadd.s32 %s3491_s27, %s3077_s22  ;;  %s4518_s17 = sshll.u32 %s352_s7, 6 }
  0x8f   : > { %s3078_s10 = sshll.u32 %s339_s28, 7  ;;  %s3081_s30 = sshll.u32 %s5912_s18, 3 }
  0x90   : > { %s4523_s11 = scalar_lea.hbm %s5559_s1, %s3078_s10  ;;  %s4526_s23 = scalar_lea.sflag [#allocation6], %s323_s5 }
  0x91   : > { %s3963_s20 = scalar_lea.hbm %s4523_s11, 1024  ;;  %p5731_p12 = scmp.ne.s32.totalorder %s5716_s19, 0 }
  0x92   : > { %p3964_p1 = scmp.ne.s32.totalorder %s4523_s11, %s3963_s20  ;;  %s3967_s7 = scalar_lea.hbm %s5559_s1, 10240 }
  0x93   : > { %p3968_p13 = scmp.lt.u32.totalorder %s4523_s11, %s5559_s1  ;;  %p3969_p2 = scmp.lt.u32.totalorder %s3967_s7, %s3963_s20 }
  0x94   : > { %p3965_p8 = pnand %p3964_p1, %p5731_p12  ;;  %p3971_p11 = scmp.lt.u32.totalorder %s3963_s20, %s4523_s11 }
  0x95   : > { %p3970_p4 = por %p3969_p2, %p3968_p13 }
  0x96   : > { %p3966_p9 = pneg %p3965_p8 }
  0x97   : > { %p3972_p0 = por %p3971_p11, %p3970_p4 }
  0x99   : > { %p3973_p3 = pnand %p3972_p0, %p3966_p9 }
  0x9b   : > { %3976 = shalt.err (!%p3973_p3)
}
  0x9c   : > { %s3977_s5 = scalar_lea.vmem %s4513_s16, 1024  ;;  %s4217_s10 = smov [#allocation5]  }
  0x9d   : > { %p3978_p5 = scmp.ne.s32.totalorder %s4513_s16, %s3977_s5  ;;  %s3981_s3 = sshll.u32 %s4217_s10, 4  ;;  %s3982_s3 = int_to_ptr.vmem [resolvable:$false] %s3981_s3 }
  0x9e   : > { %s3983_s22 = scalar_lea.vmem %s3982_s3, 2048  ;;  %p3984_p10 = scmp.lt.s32.totalorder %s4513_s16, %s3982_s3 }
  0x9f   : > { %p3979_p6 = pnand %p3978_p5, %p5731_p12  ;;  %p3985_p1 = scmp.lt.s32.totalorder %s3983_s22, %s3977_s5 }
  0xa1   : > { %p3980_p7 = pneg %p3979_p6  ;;  %p3986_p8 = por %p3985_p1, %p3984_p10 }
  0xa3   : > { %p3987_p13 = pnand %p3986_p8, %p3980_p7 }
  0xa5   : > { %3990 = shalt.err (!%p3987_p13)
}
  0xa6   : > { %3496 = dma.hbm_to_vmem [thread:$0]  (%p5731_p12), %s4523_s11, 1024, %s4513_s16, %s4526_s23  }
  0xa7   : > { %s364_s20 = sadd.s32 %s3491_s27, %s3081_s30  ;;  %s354_s4 = scalar_lea.vmem [#allocation7], %s4518_s17 }
  0xa8   : > { %s368_s7 = sshll.u32 %s354_s4, 4  ;;  %s3082_s28 = sshll.u32 %s364_s20, 7  ;;  %s369_s7 = int_to_ptr.vmem [resolvable:$true] %s368_s7 }
  0xa9   : > { %s366_s10 = scalar_lea.hbm %s5560_s2, %s3082_s28  ;;  %p5732_p2 = scmp.ne.s32.totalorder %s5720_s6, 0 }
  0xaa   : > { %s3991_s19 = scalar_lea.hbm %s366_s10, 1024  ;;  %s3995_s16 = scalar_lea.hbm %s5560_s2, 10240 }
  0xab   : > { %p3992_p9 = scmp.ne.s32.totalorder %s366_s10, %s3991_s19  ;;  %p3996_p12 = scmp.lt.u32.totalorder %s366_s10, %s5560_s2 }
  0xac   : > { %p3997_p0 = scmp.lt.u32.totalorder %s3995_s16, %s3991_s19  ;;  %p3999_p5 = scmp.lt.u32.totalorder %s3991_s19, %s366_s10 }
  0xad   : > { %p3993_p4 = pnand %p3992_p9, %p5732_p2 }
  0xae   : > { %p3998_p3 = por %p3997_p0, %p3996_p12 }
  0xaf   : > { %p3994_p11 = pneg %p3993_p4 }
  0xb0   : > { %p4000_p6 = por %p3999_p5, %p3998_p3 }
  0xb2   : > { %p4001_p7 = pnand %p4000_p6, %p3994_p11 }
  0xb4   : > { %4004 = shalt.err (!%p4001_p7)
}
  0xb5   : > { %s4005_s27 = scalar_lea.vmem %s369_s7, 1024  ;;  %s4218_s17 = smov [#allocation7]  }
  0xb6   : > { %p4006_p10 = scmp.ne.s32.totalorder %s369_s7, %s4005_s27  ;;  %s4009_s30 = sshll.u32 %s4218_s17, 4  ;;  %s4010_s30 = int_to_ptr.vmem [resolvable:$false] %s4009_s30 }
  0xb7   : > { %s4011_s20 = scalar_lea.vmem %s4010_s30, 2048  ;;  %p4012_p13 = scmp.lt.s32.totalorder %s369_s7, %s4010_s30 }
  0xb8   : > { %p4007_p1 = pnand %p4006_p10, %p5732_p2  ;;  %p4013_p9 = scmp.lt.s32.totalorder %s4011_s20, %s4005_s27 }
  0xba   : > { %p4008_p8 = pneg %p4007_p1  ;;  %p4014_p4 = por %p4013_p9, %p4012_p13 }
  0xbc   : > { %p4015_p0 = pnand %p4014_p4, %p4008_p8 }
  0xbe   : > { %4018 = shalt.err (!%p4015_p0)
}
  0xbf   : > { %3497 = dma.hbm_to_vmem [thread:$0]  (%p5732_p2), %s366_s10, 1024, %s369_s7, %s4526_s23  }
  0xc0 PF: > { %p5733_p11 = scmp.ne.s32.totalorder %s5727_s24, 0 }
  0xc2   : > { %377 = sbr.rel (%p5733_p11) target bundleno = 1610 (0x64a), region = 48 }
  0xc9   : > { %s4574_s4 = sand.u32 1, %s4153_s8   ;;  %p5734_p12 = scmp.ne.s32.totalorder %s5714_s21, 0 }
  0xca   : > { %s3084_s28 = sshll.u32 %s4574_s4, 7  ;;  %s380_s25 = scalar_lea.sflag [#allocation4], %s4574_s4 }
  0xcb   : > { %s4578_s5 = scalar_lea.vmem [#allocation3], %s3084_s28 }
  0xcc   : > { %4108 = dma.done.wait (%p5734_p12), %s380_s25, 2048  }
  0xcd   : > { %4110 = vsyncadd (%p5734_p12), %s380_s25, 4294965248  ;;  %s5735_s6 = sld [smem:[#allocation16_spill]]  ;;  %s388_s24 = sand.u32 1, %s4331_s15  }
  0xce   : > { %s5736_s23 = sld [smem:[#allocation22_spill]]  ;;  %s389_s19 = scalar_lea.sflag [#allocation6], %s388_s24 }
  0xd3   : > { %s390_s7 = sand.u32 1, %s5735_s6  }
  0xd4   : > { %s3085_s10 = sshll.u32 %s390_s7, 6  ;;  %p5737_p2 = scmp.ne.s32.totalorder %s5736_s23, 0 }
  0xd5   : > { %s4586_s3 = scalar_lea.vmem [#allocation5], %s3085_s10 }
  0xd6   : > { %4112 = dma.done.wait (%p5737_p2), %s389_s19, 1024  }
  0xd7   : > { %4114 = vsyncadd (%p5737_p2), %s389_s19, 4294966272  ;;  %s5738_s22 = sld [smem:[#allocation15_spill]]  ;;  %s5739_s16 = sld [smem:[#allocation24_spill]] }
  0xdd   : > { %s399_s18 = sand.u32 1, %s5738_s22   ;;  %p5740_p3 = scmp.ne.s32.totalorder %s5739_s16, 0 }
  0xde   : > { %s3086_s11 = sshll.u32 %s399_s18, 6 }
  0xdf   : > { %s4593_s21 = scalar_lea.vmem [#allocation7], %s3086_s11 }
  0xe0   : > { %4116 = dma.done.wait (%p5740_p3), %s389_s19, 1024  }
  0xe1   : > { %4118 = vsyncadd (%p5740_p3), %s389_s19, 4294966272  ;;  %p5741_p5 = scmp.eq.s32.totalorder %s4331_s15, 0 }
  0xe3   : > { %4120 = dma.done.wait (%p5741_p5), [#allocation9], 16384   ;;  %p5742_p6 = pmov %p5741_p5 }
  0xe4   : > { %v4603_v0 = vld [vmem:[#allocation8 + $0x4] ss:$8 sps:$4 sm:$0xff]   ;;  %v4606_v2 = vld [vmem:[#allocation8] ss:$8 sps:$4 sm:$0xff]   ;;  %v4608_v4 = vld [vmem:[#allocation8 + $0x14] ss:$8 sps:$4 sm:$0xff]  }
  0xe5   : > { %4122 = vsyncadd (%p5742_p6), [#allocation9], 4294950912  ;;  %v3695_v1 = vld [vmem:[#allocation8 + $0x204] ss:$8 sps:$4 sm:$0xff]   ;;  %1252 = vmatprep.subr.bf16.mxu1 %v4603_v0  ;;  %v3698_v3 = vld [vmem:[#allocation8 + $0x200] ss:$8 sps:$4 sm:$0xff]  }
  0xe6   : > { %1334 = vmatprep.subr.bf16.mxu0 %v3695_v1  ;;  %1253 = vmatpush1.bf16.msra.mxu1 %v4606_v2  ;;  %v3701_v5 = vld [vmem:[#allocation8 + $0x214] ss:$8 sps:$4 sm:$0xff]   ;;  %v4611_v6 = vld [vmem:[#allocation8 + $0x10] ss:$8 sps:$4 sm:$0xff]   ;;  %v4614_v8 = vld [vmem:[#allocation8 + $0x24] ss:$8 sps:$4 sm:$0xff]  }
  0xe7   : > { %1335 = vmatpush1.bf16.msra.mxu0 %v3698_v3  ;;  %1254 = vmatprep.subr.bf16.mxu1 %v4608_v4  ;;  %v3704_v7 = vld [vmem:[#allocation8 + $0x210] ss:$8 sps:$4 sm:$0xff]   ;;  %v3707_v9 = vld [vmem:[#allocation8 + $0x224] ss:$8 sps:$4 sm:$0xff]   ;;  %v4616_v10 = vld [vmem:[#allocation8 + $0x20] ss:$8 sps:$4 sm:$0xff]  }
  0xe8   : > { %1336 = vmatprep.subr.bf16.mxu0 %v3701_v5  ;;  %v3710_v11 = vld [vmem:[#allocation8 + $0x220] ss:$8 sps:$4 sm:$0xff]   ;;  %v4619_v12 = vld [vmem:[#allocation8 + $0x34] ss:$8 sps:$4 sm:$0xff]   ;;  %v4622_v14 = vld [vmem:[#allocation8 + $0x30] ss:$8 sps:$4 sm:$0xff]  }
  0xe9   : > { %v3713_v13 = vld [vmem:[#allocation8 + $0x234] ss:$8 sps:$4 sm:$0xff]   ;;  %v3716_v15 = vld [vmem:[#allocation8 + $0x230] ss:$8 sps:$4 sm:$0xff]   ;;  %v4625_v16 = vld [vmem:[#allocation8 + $0x44] ss:$8 sps:$4 sm:$0xff]  }
  0xea   : > { %1255 = vmatpush1.bf16.msra.mxu1 %v4611_v6  ;;  %v3719_v17 = vld [vmem:[#allocation8 + $0x244] ss:$8 sps:$4 sm:$0xff]   ;;  %v4628_v18 = vld [vmem:[#allocation8 + $0x40] ss:$8 sps:$4 sm:$0xff]   ;;  %v4631_v20 = vld [vmem:[#allocation8 + $0x54] ss:$8 sps:$4 sm:$0xff]  }
  0xeb   : > { %1337 = vmatpush1.bf16.msra.mxu0 %v3704_v7  ;;  %1256 = vmatprep.subr.bf16.mxu1 %v4614_v8  ;;  %v3722_v19 = vld [vmem:[#allocation8 + $0x240] ss:$8 sps:$4 sm:$0xff]   ;;  %v3725_v21 = vld [vmem:[#allocation8 + $0x254] ss:$8 sps:$4 sm:$0xff]   ;;  %v4634_v22 = vld [vmem:[#allocation8 + $0x50] ss:$8 sps:$4 sm:$0xff]  }
  0xec   : > { %1338 = vmatprep.subr.bf16.mxu0 %v3707_v9  ;;  %v3728_v23 = vld [vmem:[#allocation8 + $0x250] ss:$8 sps:$4 sm:$0xff]   ;;  %v4637_v24 = vld [vmem:[#allocation8 + $0x64] ss:$8 sps:$4 sm:$0xff]   ;;  %v4640_v26 = vld [vmem:[#allocation8 + $0x60] ss:$8 sps:$4 sm:$0xff]  }
  0xed   : > { %v3731_v25 = vld [vmem:[#allocation8 + $0x264] ss:$8 sps:$4 sm:$0xff]   ;;  %v3734_v27 = vld [vmem:[#allocation8 + $0x260] ss:$8 sps:$4 sm:$0xff]   ;;  %v4643_v28 = vld [vmem:[#allocation8 + $0x74] ss:$8 sps:$4 sm:$0xff]  }
  0xee   : > { %1257 = vmatpush1.bf16.msra.mxu1 %v4616_v10  ;;  %v4646_v29 = vld [vmem:[#allocation8 + $0x274] ss:$8 sps:$4 sm:$0xff]   ;;  %v4648_v30 = vld [vmem:[#allocation8 + $0x70] ss:$8 sps:$4 sm:$0xff]   ;;  %v4653_v32 = vld [vmem:[#allocation8 + $0x84] ss:$8 sps:$4 sm:$0xff]  }
  0xef   : > { %1339 = vmatpush1.bf16.msra.mxu0 %v3710_v11  ;;  %1258 = vmatprep.subr.bf16.mxu1 %v4619_v12  ;;  %5743 = vst [vmem:[#allocation27_spill] sm:$0xff] %v4646_v29  ;;  %v4651_v31 = vld [vmem:[#allocation8 + $0x270] ss:$8 sps:$4 sm:$0xff]   ;;  %v4657_v33 = vld [vmem:[#allocation8 + $0x284] ss:$8 sps:$4 sm:$0xff]   ;;  %s5830_s15 = sld [smem:[#allocation17_spill]] }
  0xf0   : > { %1340 = vmatprep.subr.bf16.mxu0 %v3713_v13  ;;  %5744 = vst [vmem:[#allocation28_spill] sm:$0xff] %v4651_v31  ;;  %5745 = vst [vmem:[#allocation29_spill] sm:$0xff] %v4657_v33  ;;  %v4659_v34 = vld [vmem:[#allocation8 + $0x80] ss:$8 sps:$4 sm:$0xff]   ;;  %v4665_v36 = vld [vmem:[#allocation8 + $0x94] ss:$8 sps:$4 sm:$0xff]  }
  0xf1   : > { %v4661_v35 = vld [vmem:[#allocation8 + $0x280] ss:$8 sps:$4 sm:$0xff]   ;;  %v4669_v37 = vld [vmem:[#allocation8 + $0x294] ss:$8 sps:$4 sm:$0xff]   ;;  %v4671_v38 = vld [vmem:[#allocation8 + $0x90] ss:$8 sps:$4 sm:$0xff]  }
  0xf2   : > { %1259 = vmatpush1.bf16.msra.mxu1 %v4622_v14  ;;  %5746 = vst [vmem:[#allocation30_spill] sm:$0xff] %v4661_v35  ;;  %5747 = vst [vmem:[#allocation31_spill] sm:$0xff] %v4669_v37  ;;  %v4675_v39 = vld [vmem:[#allocation8 + $0x290] ss:$8 sps:$4 sm:$0xff]   ;;  %v4677_v40 = vld [vmem:[#allocation8 + $0xa4] ss:$8 sps:$4 sm:$0xff]  }
  0xf3   : > { %1341 = vmatpush1.bf16.msra.mxu0 %v3716_v15  ;;  %1260 = vmatprep.subr.bf16.mxu1 %v4625_v16  ;;  %5748 = vst [vmem:[#allocation32_spill] sm:$0xff] %v4675_v39  ;;  %v4681_v41 = vld [vmem:[#allocation8 + $0x2a4] ss:$8 sps:$4 sm:$0xff]   ;;  %v4683_v42 = vld [vmem:[#allocation8 + $0xa0] ss:$8 sps:$4 sm:$0xff]   ;;  %vm1853_vm12 = vcmask 1046528  }
  0xf4   : > { %1342 = vmatprep.subr.bf16.mxu0 %v3719_v17  ;;  %5749 = vst [vmem:[#allocation33_spill] sm:$0xff] %v4681_v41  ;;  %v4685_v43 = vld [vmem:[#allocation8 + $0x2a0] ss:$8 sps:$4 sm:$0xff]   ;;  %v4689_v44 = vld [vmem:[#allocation8 + $0xb4] ss:$8 sps:$4 sm:$0xff]   ;;  %s4219_s20 = smov 96  }
  0xf5   : > { %5750 = vst [vmem:[#allocation34_spill] sm:$0xff] %v4685_v43  ;;  %v4693_v45 = vld [vmem:[#allocation8 + $0x2b4] ss:$8 sps:$4 sm:$0xff]   ;;  %v596_v46 = vld [vmem:[%s4586_s3 + $0x8] sm:$0xff]  ;;  %v4696_v47 = vld [vmem:[#allocation8 + $0xb0] ss:$8 sps:$4 sm:$0xff]  }
  0xf6   : > { %1261 = vmatpush1.bf16.msra.mxu1 %v4628_v18  ;;  %5751 = vst [vmem:[#allocation35_spill] sm:$0xff] %v4693_v45  ;;  %v605_v48 = vpack.c.bf16 %v596_v46, %v596_v46  ;;  %v4700_v49 = vld [vmem:[#allocation8 + $0x2b0] ss:$8 sps:$4 sm:$0xff]   ;;  %v600_v50 = vld [vmem:[%s4586_s3 + $0x28] sm:$0xff]  ;;  %v4715_v56 = vld [vmem:[#allocation8 + $0xd4] ss:$8 sps:$4 sm:$0xff]  }
  0xf7   : > { %1343 = vmatpush1.bf16.msra.mxu0 %v3722_v19  ;;  %1262 = vmatprep.subr.bf16.mxu1 %v4631_v20  ;;  %5752 = vst [vmem:[#allocation36_spill] sm:$0xff] %v4700_v49  ;;  %v4705_v51 = vld [vmem:[#allocation8 + $0xc4] ss:$8 sps:$4 sm:$0xff]   ;;  %v609_v53 = vpack.c.bf16 %v600_v50, %v600_v50  ;;  %v4709_v54 = vld [vmem:[#allocation8 + $0xc0] ss:$8 sps:$4 sm:$0xff]   ;;  %s5145_s27 = sshll.u32 %s5830_s15, 4 }
  0xf8   : > { %1344 = vmatprep.subr.bf16.mxu0 %v3725_v21  ;;  %v4707_v52 = vld [vmem:[#allocation8 + $0x2c4] ss:$8 sps:$4 sm:$0xff]   ;;  %1284 = vmatprep.mubr.bf16.mxu1 %v605_v48  ;;  %v4711_v55 = vld [vmem:[#allocation8 + $0x2c0] ss:$8 sps:$4 sm:$0xff]   ;;  %v4719_v57 = vld [vmem:[#allocation8 + $0x2d4] ss:$8 sps:$4 sm:$0xff]  }
  0xf9   : > { %5753 = vst [vmem:[#allocation37_spill] sm:$0xff] %v4707_v52  ;;  %5754 = vst [vmem:[#allocation38_spill] sm:$0xff] %v4711_v55  ;;  %1366 = vmatprep.mubr.bf16.mxu0 %v609_v53  ;;  %v4721_v58 = vld [vmem:[#allocation8 + $0xd0] ss:$8 sps:$4 sm:$0xff]   ;;  %v4727_v60 = vld [vmem:[#allocation8 + $0xe4] ss:$8 sps:$4 sm:$0xff]  }
  0xfa   : > { %1263 = vmatpush1.bf16.msra.mxu1 %v4634_v22  ;;  %5755 = vst [vmem:[#allocation39_spill] sm:$0xff] %v4719_v57  ;;  %v4723_v59 = vld [vmem:[#allocation8 + $0x2d0] ss:$8 sps:$4 sm:$0xff]   ;;  %v4731_v61 = vld [vmem:[#allocation8 + $0x2e4] ss:$8 sps:$4 sm:$0xff]   ;;  %s3090_s17 = sadd.s32 4294967288, %s5145_s27 }
  0xfb   : > { %1345 = vmatpush1.bf16.msra.mxu0 %v3728_v23  ;;  %1264 = vmatprep.subr.bf16.mxu1 %v4637_v24  ;;  %5756 = vst [vmem:[#allocation40_spill] sm:$0xff] %v4723_v59  ;;  %5757 = vst [vmem:[#allocation41_spill] sm:$0xff] %v4731_v61  ;;  %v4733_v62 = vld [vmem:[#allocation8 + $0xe0] ss:$8 sps:$4 sm:$0xff]   ;;  %v4739_v1 = vld [vmem:[#allocation8 + $0xf4] ss:$8 sps:$4 sm:$0xff]  }
  0xfc   : > { %1346 = vmatprep.subr.bf16.mxu0 %v3731_v25  ;;  %v4735_v63 = vld [vmem:[#allocation8 + $0x2e0] ss:$8 sps:$4 sm:$0xff]   ;;  %v4743_v3 = vld [vmem:[#allocation8 + $0x2f4] ss:$8 sps:$4 sm:$0xff]   ;;  %v4745_v5 = vld [vmem:[#allocation8 + $0xf0] ss:$8 sps:$4 sm:$0xff]  }
  0xfd   : > { %5758 = vst [vmem:[#allocation42_spill] sm:$0xff] %v4735_v63  ;;  %5759 = vst [vmem:[#allocation43_spill] sm:$0xff] %v4743_v3  ;;  %v4747_v7 = vld [vmem:[#allocation8 + $0x2f0] ss:$8 sps:$4 sm:$0xff]   ;;  %v4749_v9 = vld [vmem:[#allocation8 + $0x104] ss:$8 sps:$4 sm:$0xff]  }
  0xfe   : > { %1265 = vmatpush1.bf16.msra.mxu1 %v4640_v26  ;;  %5760 = vst [vmem:[#allocation44_spill] sm:$0xff] %v4747_v7  ;;  %v595_v11 = vld [vmem:[%s4586_s3] sm:$0xff]  ;;  %v4765_v25 = vld [vmem:[#allocation8 + $0x114] ss:$8 sps:$4 sm:$0xff]   ;;  %v4771_v46 = vld [vmem:[#allocation8 + $0x110] ss:$8 sps:$4 sm:$0xff]  }
  0xff   : > { %1347 = vmatpush1.bf16.msra.mxu0 %v3734_v27  ;;  %1266 = vmatprep.subr.bf16.mxu1 %v4643_v28  ;;  %v599_v13 = vld [vmem:[%s4586_s3 + $0x20] sm:$0xff]  ;;  %v604_v21 = vpack.c.bf16 %v595_v11, %v595_v11  ;;  %v4769_v27 = vld [vmem:[#allocation8 + $0x314] ss:$8 sps:$4 sm:$0xff]   ;;  %v4773_v48 = vld [vmem:[#allocation8 + $0x310] ss:$8 sps:$4 sm:$0xff]   ;;  %s1655_s30 = sadd.s32 16, %s5145_s27 }
 0x100   : > { %1348 = vmatprep.subr.bf16.mxu0 %v4646_v29  ;;  %v4757_v15 = vld [vmem:[#allocation8 + $0x304] ss:$8 sps:$4 sm:$0xff]   ;;  %v4759_v17 = vld [vmem:[#allocation8 + $0x100] ss:$8 sps:$4 sm:$0xff]   ;;  %v608_v23 = vpack.c.bf16 %v599_v13, %v599_v13  ;;  %5763 = vst [vmem:[#allocation47_spill] sm:$0xff] %v4769_v27  ;;  %5764 = vst [vmem:[#allocation48_spill] sm:$0xff] %v4773_v48 }
 0x101   : > { %5761 = vst [vmem:[#allocation45_spill] sm:$0xff] %v4757_v15  ;;  %v4761_v19 = vld [vmem:[#allocation8 + $0x300] ss:$8 sps:$4 sm:$0xff]   ;;  %v4777_v50 = vld [vmem:[#allocation8 + $0x124] ss:$8 sps:$4 sm:$0xff]   ;;  %vm1881_vm13 = vcmask 1045504  }
 0x102   : > { %1267 = vmatpush1.bf16.msra.mxu1 %v4648_v30  ;;  %5762 = vst [vmem:[#allocation46_spill] sm:$0xff] %v4761_v19  ;;  %v4781_v53 = vld [vmem:[#allocation8 + $0x324] ss:$8 sps:$4 sm:$0xff]   ;;  %v4783_v11 = vld [vmem:[#allocation8 + $0x120] ss:$8 sps:$4 sm:$0xff]   ;;  %vm1961_vm14 = vcmask 1042432  }
 0x103   : > { %1349 = vmatpush1.bf16.msra.mxu0 %v4651_v31  ;;  %1268 = vmatprep.subr.bf16.mxu1 %v4653_v32  ;;  %5765 = vst [vmem:[#allocation49_spill] sm:$0xff] %v4781_v53  ;;  %v4785_v13 = vld [vmem:[#allocation8 + $0x320] ss:$8 sps:$4 sm:$0xff]   ;;  %v4915_v29 = vld [vmem:[#allocation8 + $0x3d4] ss:$8 sps:$4 sm:$0xff]   ;;  %vm1989_vm15 = vcmask 1041408  }
 0x104   : > { %1350 = vmatprep.subr.bf16.mxu0 %v4657_v33  ;;  %5766 = vst [vmem:[#allocation50_spill] sm:$0xff] %v4785_v13  ;;  %v4903_v33 = vld [vmem:[#allocation8 + $0x3c4] ss:$8 sps:$4 sm:$0xff]   ;;  %v4909_v31 = vld [vmem:[#allocation8 + $0x3c0] ss:$8 sps:$4 sm:$0xff]   ;;  %5795 = vst [vmem:[#allocation79_spill] sm:$0xff] %v4915_v29 }
 0x105   : > { %5791 = vst [vmem:[#allocation75_spill] sm:$0xff] %v4903_v33  ;;  %5793 = vst [vmem:[#allocation77_spill] sm:$0xff] %v4909_v31  ;;  %s4220_s28 = smov 64   ;;  %s4221_s25 = smov 32  }
 0x106   : > { %1269 = vmatpush1.bf16.msra.mxu1 %v4659_v34  ;;  %s5870_s23 = sld [smem:[#allocation88_spill]]  ;;  %s5871_s18 = sld [smem:[#allocation87_spill]] }
 0x107   : > { %1351 = vmatpush1.bf16.msra.mxu0 %v4661_v35  ;;  %1270 = vmatprep.subr.bf16.mxu1 %v4665_v36  ;;  %v4897_v35 = vld [vmem:[#allocation8 + $0x3b0] ss:$8 sps:$4 sm:$0xff]   ;;  %s3088_s22 = sshll.u32 %s4574_s4, 4 }
 0x108   : > { %1352 = vmatprep.subr.bf16.mxu0 %v4669_v37  ;;  %v4891_v37 = vld [vmem:[#allocation8 + $0x3b4] ss:$8 sps:$4 sm:$0xff]   ;;  %5789 = vst [vmem:[#allocation73_spill] sm:$0xff] %v4897_v35  ;;  %s5473_s16 = scalar_lea.vmem [#allocation10], %s3088_s22  }
 0x109   : > { %5787 = vst [vmem:[#allocation71_spill] sm:$0xff] %v4891_v37 }
 0x10a   : > { %1271 = vmatpush1.bf16.msra.mxu1 %v4671_v38 }
 0x10b   : > { %1353 = vmatpush1.bf16.msra.mxu0 %v4675_v39  ;;  %1272 = vmatprep.subr.bf16.mxu1 %v4677_v40  ;;  %v4885_v39 = vld [vmem:[#allocation8 + $0x3a0] ss:$8 sps:$4 sm:$0xff]  }
 0x10c   : > { %1354 = vmatprep.subr.bf16.mxu0 %v4681_v41  ;;  %v4879_v41 = vld [vmem:[#allocation8 + $0x3a4] ss:$8 sps:$4 sm:$0xff]   ;;  %5785 = vst [vmem:[#allocation69_spill] sm:$0xff] %v4885_v39 }
 0x10d   : > { %5783 = vst [vmem:[#allocation67_spill] sm:$0xff] %v4879_v41 }
 0x10e   : > { %1273 = vmatpush1.bf16.msra.mxu1 %v4683_v42 }
 0x10f   : > { %1355 = vmatpush1.bf16.msra.mxu0 %v4685_v43  ;;  %1274 = vmatprep.subr.bf16.mxu1 %v4689_v44  ;;  %v4873_v43 = vld [vmem:[#allocation8 + $0x390] ss:$8 sps:$4 sm:$0xff]  }
 0x110   : > { %1356 = vmatprep.subr.bf16.mxu0 %v4693_v45  ;;  %v4867_v45 = vld [vmem:[#allocation8 + $0x394] ss:$8 sps:$4 sm:$0xff]   ;;  %5781 = vst [vmem:[#allocation65_spill] sm:$0xff] %v4873_v43 }
 0x111   : > { %5779 = vst [vmem:[#allocation63_spill] sm:$0xff] %v4867_v45 }
 0x112   : > { %1275 = vmatpush1.bf16.msra.mxu1 %v4696_v47 }
 0x113   : > { %1357 = vmatpush1.bf16.msra.mxu0 %v4700_v49  ;;  %1276 = vmatprep.subr.bf16.mxu1 %v4705_v51  ;;  %v4841_v49 = vld [vmem:[#allocation8 + $0x174] ss:$8 sps:$4 sm:$0xff]  }
 0x114   : > { %1358 = vmatprep.subr.bf16.mxu0 %v4707_v52  ;;  %v4837_v52 = vld [vmem:[#allocation8 + $0x360] ss:$8 sps:$4 sm:$0xff]  }
 0x115   : > { %5774 = vst [vmem:[#allocation58_spill] sm:$0xff] %v4837_v52 }
 0x116   : > { %1277 = vmatpush1.bf16.msra.mxu1 %v4709_v54 }
 0x117   : > { %1359 = vmatpush1.bf16.msra.mxu0 %v4711_v55  ;;  %1278 = vmatprep.subr.bf16.mxu1 %v4715_v56  ;;  %v4835_v55 = vld [vmem:[#allocation8 + $0x160] ss:$8 sps:$4 sm:$0xff]  }
 0x118   : > { %1360 = vmatprep.subr.bf16.mxu0 %v4719_v57  ;;  %v602_v57 = vld [vmem:[%s4586_s3 + $0x38] sm:$0xff] }
 0x11a   : > { %1279 = vmatpush1.bf16.msra.mxu1 %v4721_v58 }
 0x11b   : > { %1361 = vmatpush1.bf16.msra.mxu0 %v4723_v59  ;;  %1280 = vmatprep.subr.bf16.mxu1 %v4727_v60  ;;  %v598_v59 = vld [vmem:[%s4586_s3 + $0x18] sm:$0xff] }
 0x11c   : > { %1362 = vmatprep.subr.bf16.mxu0 %v4731_v61  ;;  %v4825_v61 = vld [vmem:[#allocation8 + $0x164] ss:$8 sps:$4 sm:$0xff]  }
 0x11e   : > { %1281 = vmatpush1.bf16.msra.mxu1 %v4733_v62 }
 0x11f   : > { %1363 = vmatpush1.bf16.msra.mxu0 %v4735_v63  ;;  %1282 = vmatprep.subr.bf16.mxu1 %v4739_v1  ;;  %v4821_v63 = vld [vmem:[#allocation8 + $0x350] ss:$8 sps:$4 sm:$0xff]  }
 0x120   : > { %1364 = vmatprep.subr.bf16.mxu0 %v4743_v3  ;;  %v4813_v3 = vld [vmem:[#allocation8 + $0x154] ss:$8 sps:$4 sm:$0xff]   ;;  %5772 = vst [vmem:[#allocation56_spill] sm:$0xff] %v4821_v63 }
 0x122   : > { %1283 = vmatpush1.bf16.msra.mxu1 %v4745_v5 }
 0x123   : > { %1365 = vmatpush1.bf16.msra.mxu0 %v4747_v7  ;;  %1293 = vmatprep.subr.bf16.mxu1 %v4749_v9  ;;  %v4807_v7 = vld [vmem:[#allocation8 + $0x140] ss:$8 sps:$4 sm:$0xff]  }
 0x124   : > { %1375 = vmatprep.subr.bf16.mxu0 %v4757_v15  ;;  %v4801_v15 = vld [vmem:[#allocation8 + $0x144] ss:$8 sps:$4 sm:$0xff]  }
 0x125   : > { %1285 = vmatmul.mubr.bf16.vlgmr.msra.gmra.mrb[0].mxu1 %v604_v21  ;;  %v4789_v21 = vld [vmem:[#allocation8 + $0x134] ss:$8 sps:$4 sm:$0xff]  }
 0x126   : > { %1367 = vmatmul.mubr.bf16.vlgmr.msra.gmra.mrb[0].mxu0 %v608_v23  ;;  %1294 = vmatpush1.bf16.msra.mxu1 %v4759_v17  ;;  %v4793_v23 = vld [vmem:[#allocation8 + $0x334] ss:$8 sps:$4 sm:$0xff]  }
 0x127   : > { %1376 = vmatpush1.bf16.msra.mxu0 %v4761_v19  ;;  %1295 = vmatprep.subr.bf16.mxu1 %v4765_v25  ;;  %5767 = vst [vmem:[#allocation51_spill] sm:$0xff] %v4793_v23  ;;  %v4795_v19 = vld [vmem:[#allocation8 + $0x130] ss:$8 sps:$4 sm:$0xff]  }
 0x128   : > { %1377 = vmatprep.subr.bf16.mxu0 %v4769_v27  ;;  %v4797_v27 = vld [vmem:[#allocation8 + $0x330] ss:$8 sps:$4 sm:$0xff]  }
 0x129   : > { %5768 = vst [vmem:[#allocation52_spill] sm:$0xff] %v4797_v27 }
 0x12a   : > { %1296 = vmatpush1.bf16.msra.mxu1 %v4771_v46 }
 0x12b   : > { %1378 = vmatpush1.bf16.msra.mxu0 %v4773_v48  ;;  %1297 = vmatprep.subr.bf16.mxu1 %v4777_v50  ;;  %v4805_v48 = vld [vmem:[#allocation8 + $0x344] ss:$8 sps:$4 sm:$0xff]  }
 0x12c   : > { %1379 = vmatprep.subr.bf16.mxu0 %v4781_v53  ;;  %5769 = vst [vmem:[#allocation53_spill] sm:$0xff] %v4805_v48  ;;  %v4809_v53 = vld [vmem:[#allocation8 + $0x340] ss:$8 sps:$4 sm:$0xff]  }
 0x12d   : > { %5770 = vst [vmem:[#allocation54_spill] sm:$0xff] %v4809_v53 }
 0x12e   : > { %1298 = vmatpush1.bf16.msra.mxu1 %v4783_v11 }
 0x12f   : > { %1380 = vmatpush1.bf16.msra.mxu0 %v4785_v13  ;;  %1299 = vmatprep.subr.bf16.mxu1 %v4789_v21  ;;  %v4817_v13 = vld [vmem:[#allocation8 + $0x354] ss:$8 sps:$4 sm:$0xff]  }
 0x130   : > { %1381 = vmatprep.subr.bf16.mxu0 %v4793_v23  ;;  %5771 = vst [vmem:[#allocation55_spill] sm:$0xff] %v4817_v13  ;;  %v4819_v23 = vld [vmem:[#allocation8 + $0x150] ss:$8 sps:$4 sm:$0xff]  }
 0x132   : > { %1300 = vmatpush1.bf16.msra.mxu1 %v4795_v19 }
 0x133   : > { %1382 = vmatpush1.bf16.msra.mxu0 %v4797_v27  ;;  %1301 = vmatprep.subr.bf16.mxu1 %v4801_v15  ;;  %v4829_v27 = vld [vmem:[#allocation8 + $0x364] ss:$8 sps:$4 sm:$0xff]  }
 0x134   : > { %1383 = vmatprep.subr.bf16.mxu0 %v4805_v48  ;;  %5773 = vst [vmem:[#allocation57_spill] sm:$0xff] %v4829_v27  ;;  %v607_v48 = vpack.c.bf16 %v598_v59, %v598_v59  ;;  %v4847_v59 = vld [vmem:[#allocation8 + $0x170] ss:$8 sps:$4 sm:$0xff]  }
 0x136   : > { %1302 = vmatpush1.bf16.msra.mxu1 %v4807_v7  ;;  %1325 = vmatprep.mubr.bf16.mxu1 %v607_v48  ;;  %v4859_v48 = vld [vmem:[#allocation8 + $0x180] ss:$8 sps:$4 sm:$0xff]  }
 0x137   : > { %1384 = vmatpush1.bf16.msra.mxu0 %v4809_v53  ;;  %1303 = vmatprep.subr.bf16.mxu1 %v4813_v3  ;;  %v611_v53 = vpack.c.bf16 %v602_v57, %v602_v57  ;;  %v4853_v57 = vld [vmem:[#allocation8 + $0x184] ss:$8 sps:$4 sm:$0xff]  }
 0x138   : > { %1385 = vmatprep.subr.bf16.mxu0 %v4817_v13  ;;  %v4843_v13 = vld [vmem:[#allocation8 + $0x374] ss:$8 sps:$4 sm:$0xff]  }
 0x139   : > { %5775 = vst [vmem:[#allocation59_spill] sm:$0xff] %v4843_v13  ;;  %1407 = vmatprep.mubr.bf16.mxu0 %v611_v53  ;;  %v4861_v53 = vld [vmem:[#allocation8 + $0x380] ss:$8 sps:$4 sm:$0xff]  }
 0x13a   : > { %1304 = vmatpush1.bf16.msra.mxu1 %v4819_v23  ;;  %5778 = vst [vmem:[#allocation62_spill] sm:$0xff] %v4861_v53 }
 0x13b   : > { %1386 = vmatpush1.bf16.msra.mxu0 %v4821_v63  ;;  %1305 = vmatprep.subr.bf16.mxu1 %v4825_v61  ;;  %v4849_v63 = vld [vmem:[#allocation8 + $0x370] ss:$8 sps:$4 sm:$0xff]  }
 0x13c   : > { %1387 = vmatprep.subr.bf16.mxu0 %v4829_v27  ;;  %5776 = vst [vmem:[#allocation60_spill] sm:$0xff] %v4849_v63  ;;  %v4855_v27 = vld [vmem:[#allocation8 + $0x384] ss:$8 sps:$4 sm:$0xff]  }
 0x13d   : > { %5777 = vst [vmem:[#allocation61_spill] sm:$0xff] %v4855_v27 }
 0x13e   : > { %1306 = vmatpush1.bf16.msra.mxu1 %v4835_v55 }
 0x13f   : > { %1388 = vmatpush1.bf16.msra.mxu0 %v4837_v52  ;;  %1307 = vmatprep.subr.bf16.mxu1 %v4841_v49  ;;  %v4865_v52 = vld [vmem:[#allocation8 + $0x194] ss:$8 sps:$4 sm:$0xff]  }
 0x140   : > { %1389 = vmatprep.subr.bf16.mxu0 %v4843_v13  ;;  %v4871_v13 = vld [vmem:[#allocation8 + $0x190] ss:$8 sps:$4 sm:$0xff]  }
 0x141   : > { %5780 = vst [vmem:[#allocation64_spill] sm:$0xff] %v4871_v13 }
 0x142   : > { %1308 = vmatpush1.bf16.msra.mxu1 %v4847_v59 }
 0x143   : > { %1390 = vmatpush1.bf16.msra.mxu0 %v4849_v63  ;;  %1309 = vmatprep.subr.bf16.mxu1 %v4853_v57  ;;  %v4877_v63 = vld [vmem:[#allocation8 + $0x1a4] ss:$8 sps:$4 sm:$0xff]  }
 0x144   : > { %1391 = vmatprep.subr.bf16.mxu0 %v4855_v27  ;;  %5782 = vst [vmem:[#allocation66_spill] sm:$0xff] %v4877_v63  ;;  %v4883_v27 = vld [vmem:[#allocation8 + $0x1a0] ss:$8 sps:$4 sm:$0xff]  }
 0x145   : > { %5784 = vst [vmem:[#allocation68_spill] sm:$0xff] %v4883_v27 }
 0x146   : > { %1310 = vmatpush1.bf16.msra.mxu1 %v4859_v48 }
 0x147   : > { %1392 = vmatpush1.bf16.msra.mxu0 %v4861_v53  ;;  %1311 = vmatprep.subr.bf16.mxu1 %v4865_v52  ;;  %v4889_v53 = vld [vmem:[#allocation8 + $0x1b4] ss:$8 sps:$4 sm:$0xff]  }
 0x148   : > { %1393 = vmatprep.subr.bf16.mxu0 %v4867_v45  ;;  %5786 = vst [vmem:[#allocation70_spill] sm:$0xff] %v4889_v53  ;;  %v4895_v45 = vld [vmem:[#allocation8 + $0x1b0] ss:$8 sps:$4 sm:$0xff]  }
 0x149   : > { %5788 = vst [vmem:[#allocation72_spill] sm:$0xff] %v4895_v45 }
 0x14a   : > { %1312 = vmatpush1.bf16.msra.mxu1 %v4871_v13  ;;  %v1648_v13 = vld [vmem:[%s4593_s21 + $0x8] sm:$0xff] }
 0x14b   : > { %1394 = vmatpush1.bf16.msra.mxu0 %v4873_v43  ;;  %1313 = vmatprep.subr.bf16.mxu1 %v4877_v63  ;;  %v4901_v43 = vld [vmem:[#allocation8 + $0x1c4] ss:$8 sps:$4 sm:$0xff]  }
 0x14c   : > { %1395 = vmatprep.subr.bf16.mxu0 %v4879_v41  ;;  %5790 = vst [vmem:[#allocation74_spill] sm:$0xff] %v4901_v43  ;;  %v4907_v41 = vld [vmem:[#allocation8 + $0x1c0] ss:$8 sps:$4 sm:$0xff]  }
 0x14d   : > { %5792 = vst [vmem:[#allocation76_spill] sm:$0xff] %v4907_v41  ;;  %v1438_v63 = vld [vmem:[%s4578_s5 + $0x48] sm:$0xff] }
 0x14e   : > { %1314 = vmatpush1.bf16.msra.mxu1 %v4883_v27  ;;  %v1430_v27 = vld [vmem:[%s4578_s5 + $0x8] sm:$0xff] }
 0x14f   : > { %1396 = vmatpush1.bf16.msra.mxu0 %v4885_v39  ;;  %1315 = vmatprep.subr.bf16.mxu1 %v4889_v53  ;;  %v4913_v39 = vld [vmem:[#allocation8 + $0x1d4] ss:$8 sps:$4 sm:$0xff]  }
 0x150   : > { %1397 = vmatprep.subr.bf16.mxu0 %v4891_v37  ;;  %5794 = vst [vmem:[#allocation78_spill] sm:$0xff] %v4913_v39  ;;  %v4919_v37 = vld [vmem:[#allocation8 + $0x1d0] ss:$8 sps:$4 sm:$0xff]  }
 0x151   : > { %5796 = vst [vmem:[#allocation80_spill] sm:$0xff] %v4919_v37  ;;  %v601_v53 = vld [vmem:[%s4586_s3 + $0x30] sm:$0xff] }
 0x152   : > { %1316 = vmatpush1.bf16.msra.mxu1 %v4895_v45  ;;  %v4921_v45 = vld [vmem:[#allocation8 + $0x3d0] ss:$8 sps:$4 sm:$0xff]  }
 0x153   : > { %1398 = vmatpush1.bf16.msra.mxu0 %v4897_v35  ;;  %1317 = vmatprep.subr.bf16.mxu1 %v4901_v43  ;;  %5797 = vst [vmem:[#allocation81_spill] sm:$0xff] %v4921_v45  ;;  %v4925_v35 = vld [vmem:[#allocation8 + $0x1e4] ss:$8 sps:$4 sm:$0xff]   ;;  %v4941_v43 = vld [vmem:[#allocation8 + $0x1f0] ss:$8 sps:$4 sm:$0xff]  }
 0x154   : > { %1399 = vmatprep.subr.bf16.mxu0 %v4903_v33  ;;  %5798 = vst [vmem:[#allocation82_spill] sm:$0xff] %v4925_v35  ;;  %v4927_v33 = vld [vmem:[#allocation8 + $0x3e4] ss:$8 sps:$4 sm:$0xff]  }
 0x155   : > { %5799 = vst [vmem:[#allocation83_spill] sm:$0xff] %v4927_v33 }
 0x156   : > { %1318 = vmatpush1.bf16.msra.mxu1 %v4907_v41  ;;  %v4931_v41 = vld [vmem:[#allocation8 + $0x1e0] ss:$8 sps:$4 sm:$0xff]  }
 0x157   : > { %1400 = vmatpush1.bf16.msra.mxu0 %v4909_v31  ;;  %1319 = vmatprep.subr.bf16.mxu1 %v4913_v39  ;;  %5800 = vst [vmem:[#allocation84_spill] sm:$0xff] %v4931_v41  ;;  %v4933_v31 = vld [vmem:[#allocation8 + $0x3e0] ss:$8 sps:$4 sm:$0xff]   ;;  %v4939_v39 = vld [vmem:[#allocation8 + $0x3f4] ss:$8 sps:$4 sm:$0xff]  }
 0x158   : > { %1401 = vmatprep.subr.bf16.mxu0 %v4915_v29  ;;  %5801 = vst [vmem:[#allocation85_spill] sm:$0xff] %v4933_v31  ;;  %v4937_v29 = vld [vmem:[#allocation8 + $0x1f4] ss:$8 sps:$4 sm:$0xff]  }
 0x15a   : > { %1320 = vmatpush1.bf16.msra.mxu1 %v4919_v37  ;;  %v597_v37 = vld [vmem:[%s4586_s3 + $0x10] sm:$0xff] }
 0x15b   : > { %1402 = vmatpush1.bf16.msra.mxu0 %v4921_v45  ;;  %1321 = vmatprep.subr.bf16.mxu1 %v4925_v35  ;;  %v4945_v45 = vld [vmem:[#allocation8 + $0x3f0] ss:$8 sps:$4 sm:$0xff]   ;;  %v606_v35 = vpack.c.bf16 %v597_v37, %v597_v37 }
 0x15c   : > { %1403 = vmatprep.subr.bf16.mxu0 %v4927_v33  ;;  %v610_v33 = vpack.c.bf16 %v601_v53, %v601_v53  ;;  %v1439_v37 = vld [vmem:[%s4578_s5 + $0x50] sm:$0xff]  ;;  %v1433_v53 = vld [vmem:[%s4578_s5 + $0x20] sm:$0xff] }
 0x15e   : > { %1322 = vmatpush1.bf16.msra.mxu1 %v4931_v41  ;;  %v1657_v41 = vpack.c.bf16 %v1648_v13, %v1648_v13  ;;  %v5823_v13 = vld [vmem:[#allocation37_spill] sm:$0xff] }
 0x15f   : > { %1404 = vmatpush1.bf16.msra.mxu0 %v4933_v31  ;;  %1323 = vmatprep.subr.bf16.mxu1 %v4937_v29  ;;  %v1446_v31 = vpack.c.bf16 %v1438_v63, %v1430_v27  ;;  %v3903_v63 = vld [vmem:[#allocation8 + $0x254] ss:$8 sps:$4 sm:$0xff]  }
 0x160   : > { %1405 = vmatprep.subr.bf16.mxu0 %v4939_v39  ;;  %v5819_v27 = vld [vmem:[#allocation33_spill] sm:$0xff] }
 0x162   : > { %1324 = vmatpush1.bf16.msra.mxu1 %v4941_v43 }
 0x163   : > { %1406 = vmatpush1.bf16.msra.mxu0 %v4945_v45  ;;  %1453 = vmatprep.subr.bf16.mxu1 %v4603_v0 }
 0x164   : > { %1664 = vmatprep.subr.bf16.mxu0 %v4603_v0  ;;  %v1429_v0 = vld [vmem:[%s4578_s5] sm:$0xff] }
 0x165   : > { %1326 = vmatmul.mubr.bf16.vlgmr.msra.gmra.mrb[0].mxu1 %v606_v35  ;;  %v5812_v35 = vld [vmem:[#allocation84_spill] sm:$0xff] }
 0x166   : > { %1408 = vmatmul.mubr.bf16.vlgmr.msra.gmra.mrb[0].mxu0 %v610_v33  ;;  %1454 = vmatpush1.bf16.msra.mxu1 %v4606_v2  ;;  %v5810_v33 = vld [vmem:[#allocation80_spill] sm:$0xff] }
 0x167   : > { %1665 = vmatpush1.bf16.msra.mxu0 %v4606_v2  ;;  %1455 = vmatprep.subr.bf16.mxu1 %v4608_v4  ;;  %v1437_v2 = vld [vmem:[%s4578_s5 + $0x40] sm:$0xff] }
 0x168   : > { %1666 = vmatprep.subr.bf16.mxu0 %v4608_v4  ;;  %1485 = vmatprep.mubr.bf16.mxu1 %v1446_v31  ;;  %v1647_v4 = vld [vmem:[%s4593_s21] sm:$0xff]  ;;  %v5808_v31 = vld [vmem:[#allocation76_spill] sm:$0xff] }
 0x169   : > { %1696 = vmatprep.mubr.bf16.mxu0 %v1657_v41 }
 0x16a   : > { %1456 = vmatpush1.bf16.msra.mxu1 %v4611_v6 }
 0x16b   : > { %1667 = vmatpush1.bf16.msra.mxu0 %v4611_v6  ;;  %1457 = vmatprep.subr.bf16.mxu1 %v4614_v8  ;;  %v1445_v6 = vpack.c.bf16 %v1437_v2, %v1429_v0  ;;  %v1441_v0 = vld [vmem:[%s4578_s5 + $0x60] sm:$0xff] }
 0x16c   : > { %1668 = vmatprep.subr.bf16.mxu0 %v4614_v8  ;;  %v1656_v8 = vpack.c.bf16 %v1647_v4, %v1647_v4  ;;  %v1651_v2 = vld [vmem:[%s4593_s21 + $0x20] sm:$0xff] }
 0x16d   : > { %v5829_v4 = vld [vmem:[#allocation43_spill] sm:$0xff] }
 0x16e   : > { %1458 = vmatpush1.bf16.msra.mxu1 %v4616_v10 }
 0x16f   : > { %1669 = vmatpush1.bf16.msra.mxu0 %v4616_v10  ;;  %1459 = vmatprep.subr.bf16.mxu1 %v4619_v12  ;;  %v1432_v10 = vld [vmem:[%s4578_s5 + $0x18] sm:$0xff] }
 0x170   : > { %1670 = vmatprep.subr.bf16.mxu0 %v4619_v12  ;;  %v1440_v12 = vld [vmem:[%s4578_s5 + $0x58] sm:$0xff] }
 0x172   : > { %1460 = vmatpush1.bf16.msra.mxu1 %v4622_v14 }
 0x173   : > { %1671 = vmatpush1.bf16.msra.mxu0 %v4622_v14  ;;  %1461 = vmatprep.subr.bf16.mxu1 %v4625_v16  ;;  %v1650_v14 = vld [vmem:[%s4593_s21 + $0x18] sm:$0xff] }
 0x174   : > { %1672 = vmatprep.subr.bf16.mxu0 %v4625_v16  ;;  %v1448_v16 = vpack.c.bf16 %v1440_v12, %v1432_v10  ;;  %v1436_v10 = vld [vmem:[%s4578_s5 + $0x38] sm:$0xff] }
 0x175   : > { %v1444_v12 = vld [vmem:[%s4578_s5 + $0x78] sm:$0xff] }
 0x176   : > { %1462 = vmatpush1.bf16.msra.mxu1 %v4628_v18 }
 0x177   : > { %1673 = vmatpush1.bf16.msra.mxu0 %v4628_v18  ;;  %1463 = vmatprep.subr.bf16.mxu1 %v4631_v20  ;;  %v1659_v18 = vpack.c.bf16 %v1650_v14, %v1650_v14  ;;  %v1654_v14 = vld [vmem:[%s4593_s21 + $0x38] sm:$0xff] }
 0x178   : > { %1674 = vmatprep.subr.bf16.mxu0 %v4631_v20  ;;  %v5802_v20 = vld [vmem:[#allocation64_spill] sm:$0xff] }
 0x17a   : > { %1464 = vmatpush1.bf16.msra.mxu1 %v4634_v22 }
 0x17b   : > { %1675 = vmatpush1.bf16.msra.mxu0 %v4634_v22  ;;  %1465 = vmatprep.subr.bf16.mxu1 %v4637_v24  ;;  %v5803_v22 = vld [vmem:[#allocation66_spill] sm:$0xff] }
 0x17c   : > { %1676 = vmatprep.subr.bf16.mxu0 %v4637_v24  ;;  %v5804_v24 = vld [vmem:[#allocation68_spill] sm:$0xff] }
 0x17e   : > { %1466 = vmatpush1.bf16.msra.mxu1 %v4640_v26 }
 0x17f   : > { %1677 = vmatpush1.bf16.msra.mxu0 %v4640_v26  ;;  %1467 = vmatprep.subr.bf16.mxu1 %v4643_v28  ;;  %v5805_v26 = vld [vmem:[#allocation70_spill] sm:$0xff] }
 0x180   : > { %1678 = vmatprep.subr.bf16.mxu0 %v4643_v28  ;;  %v5806_v28 = vld [vmem:[#allocation72_spill] sm:$0xff] }
 0x182   : > { %1468 = vmatpush1.bf16.msra.mxu1 %v4648_v30 }
 0x183   : > { %1679 = vmatpush1.bf16.msra.mxu0 %v4648_v30  ;;  %1469 = vmatprep.subr.bf16.mxu1 %v4653_v32  ;;  %v5807_v30 = vld [vmem:[#allocation74_spill] sm:$0xff] }
 0x184   : > { %1680 = vmatprep.subr.bf16.mxu0 %v4653_v32  ;;  %v5809_v32 = vld [vmem:[#allocation78_spill] sm:$0xff] }
 0x186   : > { %1470 = vmatpush1.bf16.msra.mxu1 %v4659_v34 }
 0x187   : > { %1681 = vmatpush1.bf16.msra.mxu0 %v4659_v34  ;;  %1471 = vmatprep.subr.bf16.mxu1 %v4665_v36  ;;  %v5811_v34 = vld [vmem:[#allocation82_spill] sm:$0xff] }
 0x188   : > { %1682 = vmatprep.subr.bf16.mxu0 %v4665_v36  ;;  %v1431_v36 = vld [vmem:[%s4578_s5 + $0x10] sm:$0xff] }
 0x18a   : > { %1472 = vmatpush1.bf16.msra.mxu1 %v4671_v38 }
 0x18b   : > { %1683 = vmatpush1.bf16.msra.mxu0 %v4671_v38  ;;  %1473 = vmatprep.subr.bf16.mxu1 %v4677_v40  ;;  %v1649_v38 = vld [vmem:[%s4593_s21 + $0x10] sm:$0xff] }
 0x18c   : > { %1684 = vmatprep.subr.bf16.mxu0 %v4677_v40  ;;  %v1447_v40 = vpack.c.bf16 %v1439_v37, %v1431_v36  ;;  %v1658_v41 = vpack.c.bf16 %v1649_v38, %v1649_v38  ;;  %v5839_v37 = vld [vmem:[#allocation52_spill] sm:$0xff]  ;;  %v5840_v38 = vld [vmem:[#allocation53_spill] sm:$0xff] }
 0x18e   : > { %1474 = vmatpush1.bf16.msra.mxu1 %v4683_v42 }
 0x18f   : > { %1685 = vmatpush1.bf16.msra.mxu0 %v4683_v42  ;;  %1475 = vmatprep.subr.bf16.mxu1 %v4689_v44  ;;  %v1434_v42 = vld [vmem:[%s4578_s5 + $0x28] sm:$0xff] }
 0x190   : > { %1686 = vmatprep.subr.bf16.mxu0 %v4689_v44  ;;  %v1442_v44 = vld [vmem:[%s4578_s5 + $0x68] sm:$0xff] }
 0x192   : > { %1476 = vmatpush1.bf16.msra.mxu1 %v4696_v47 }
 0x193   : > { %1687 = vmatpush1.bf16.msra.mxu0 %v4696_v47  ;;  %1477 = vmatprep.subr.bf16.mxu1 %v4705_v51  ;;  %v1652_v47 = vld [vmem:[%s4593_s21 + $0x28] sm:$0xff] }
 0x194   : > { %1688 = vmatprep.subr.bf16.mxu0 %v4705_v51  ;;  %v1450_v51 = vpack.c.bf16 %v1442_v44, %v1434_v42 }
 0x196   : > { %1478 = vmatpush1.bf16.msra.mxu1 %v4709_v54 }
 0x197   : > { %1689 = vmatpush1.bf16.msra.mxu0 %v4709_v54  ;;  %1479 = vmatprep.subr.bf16.mxu1 %v4715_v56  ;;  %v3894_v54 = vld [vmem:[#allocation8 + $0x200] ss:$8 sps:$4 sm:$0xff]  }
 0x198   : > { %1690 = vmatprep.subr.bf16.mxu0 %v4715_v56  ;;  %v3897_v56 = vld [vmem:[#allocation8 + $0x224] ss:$8 sps:$4 sm:$0xff]  }
 0x19a   : > { %1480 = vmatpush1.bf16.msra.mxu1 %v4721_v58 }
 0x19b   : > { %1691 = vmatpush1.bf16.msra.mxu0 %v4721_v58  ;;  %1481 = vmatprep.subr.bf16.mxu1 %v4727_v60  ;;  %v3899_v58 = vld [vmem:[#allocation8 + $0x234] ss:$8 sps:$4 sm:$0xff]  }
 0x19c   : > { %1692 = vmatprep.subr.bf16.mxu0 %v4727_v60  ;;  %v3900_v60 = vld [vmem:[#allocation8 + $0x230] ss:$8 sps:$4 sm:$0xff]  }
 0x19e   : > { %1482 = vmatpush1.bf16.msra.mxu1 %v4733_v62 }
 0x19f   : > { %1693 = vmatpush1.bf16.msra.mxu0 %v4733_v62  ;;  %1483 = vmatprep.subr.bf16.mxu1 %v4739_v1  ;;  %v3902_v62 = vld [vmem:[#allocation8 + $0x240] ss:$8 sps:$4 sm:$0xff]  }
 0x1a0   : > { %1694 = vmatprep.subr.bf16.mxu0 %v4739_v1  ;;  %v3904_v1 = vld [vmem:[#allocation8 + $0x250] ss:$8 sps:$4 sm:$0xff]  }
 0x1a2   : > { %1484 = vmatpush1.bf16.msra.mxu1 %v4745_v5 }
 0x1a3   : > { %1695 = vmatpush1.bf16.msra.mxu0 %v4745_v5  ;;  %1496 = vmatprep.subr.bf16.mxu1 %v4749_v9  ;;  %v3906_v5 = vld [vmem:[#allocation8 + $0x260] ss:$8 sps:$4 sm:$0xff]  }
 0x1a4   : > { %1705 = vmatprep.subr.bf16.mxu0 %v4749_v9  ;;  %v5814_v9 = vld [vmem:[#allocation28_spill] sm:$0xff] }
 0x1a5   : > { %1486 = vmatmul.mubr.bf16.vlgmr.msra.gmra.mrb[4].mxu1 %v1445_v6  ;;  %v1449_v6 = vpack.c.bf16 %v1441_v0, %v1433_v53 }
 0x1a6   : > { %1697 = vmatmul.mubr.bf16.vlgmr.msra.gmra.mrb[4].mxu0 %v1656_v8  ;;  %1497 = vmatpush1.bf16.msra.mxu1 %v4759_v17  ;;  %v1660_v8 = vpack.c.bf16 %v1651_v2, %v1651_v2  ;;  %v1626_v2 = vstv %s5145_s27 }
 0x1a7   : > { %1706 = vmatpush1.bf16.msra.mxu0 %v4759_v17  ;;  %1498 = vmatprep.subr.bf16.mxu1 %v4765_v25  ;;  %v5816_v17 = vld [vmem:[#allocation30_spill] sm:$0xff] }
 0x1a8   : > { %1707 = vmatprep.subr.bf16.mxu0 %v4765_v25  ;;  %1528 = vmatprep.mubr.bf16.mxu1 %v1448_v16  ;;  %v5818_v25 = vld [vmem:[#allocation32_spill] sm:$0xff] }
 0x1a9   : > { %1737 = vmatprep.mubr.bf16.mxu0 %v1659_v18  ;;  %v5831_v16 = vld [vmem:[#allocation44_spill] sm:$0xff]  ;;  %v5832_v18 = vld [vmem:[#allocation45_spill] sm:$0xff] }
 0x1aa   : > { %1499 = vmatpush1.bf16.msra.mxu1 %v4771_v46 }
 0x1ab   : > { %1708 = vmatpush1.bf16.msra.mxu0 %v4771_v46  ;;  %1500 = vmatprep.subr.bf16.mxu1 %v4777_v50  ;;  %v5820_v46 = vld [vmem:[#allocation34_spill] sm:$0xff] }
 0x1ac   : > { %1709 = vmatprep.subr.bf16.mxu0 %v4777_v50  ;;  %v5821_v50 = vld [vmem:[#allocation35_spill] sm:$0xff] }
 0x1ae   : > { %1501 = vmatpush1.bf16.msra.mxu1 %v4783_v11 }
 0x1af   : > { %1710 = vmatpush1.bf16.msra.mxu0 %v4783_v11  ;;  %1502 = vmatprep.subr.bf16.mxu1 %v4789_v21  ;;  %v5822_v11 = vld [vmem:[#allocation36_spill] sm:$0xff] }
 0x1b0   : > { %1711 = vmatprep.subr.bf16.mxu0 %v4789_v21  ;;  %v5824_v21 = vld [vmem:[#allocation38_spill] sm:$0xff] }
 0x1b2   : > { %1503 = vmatpush1.bf16.msra.mxu1 %v4795_v19 }
 0x1b3   : > { %1712 = vmatpush1.bf16.msra.mxu0 %v4795_v19  ;;  %1504 = vmatprep.subr.bf16.mxu1 %v4801_v15  ;;  %v5817_v19 = vld [vmem:[#allocation31_spill] sm:$0xff] }
 0x1b4   : > { %1713 = vmatprep.subr.bf16.mxu0 %v4801_v15  ;;  %v5815_v15 = vld [vmem:[#allocation29_spill] sm:$0xff] }
 0x1b6   : > { %1505 = vmatpush1.bf16.msra.mxu1 %v4807_v7 }
 0x1b7   : > { %1714 = vmatpush1.bf16.msra.mxu0 %v4807_v7  ;;  %1506 = vmatprep.subr.bf16.mxu1 %v4813_v3  ;;  %v5813_v7 = vld [vmem:[#allocation27_spill] sm:$0xff] }
 0x1b8   : > { %1715 = vmatprep.subr.bf16.mxu0 %v4813_v3  ;;  %v3905_v3 = vld [vmem:[#allocation8 + $0x264] ss:$8 sps:$4 sm:$0xff]  }
 0x1ba   : > { %1507 = vmatpush1.bf16.msra.mxu1 %v4819_v23 }
 0x1bb   : > { %1716 = vmatpush1.bf16.msra.mxu0 %v4819_v23  ;;  %1508 = vmatprep.subr.bf16.mxu1 %v4825_v61  ;;  %v5825_v23 = vld [vmem:[#allocation39_spill] sm:$0xff] }
 0x1bc   : > { %1717 = vmatprep.subr.bf16.mxu0 %v4825_v61  ;;  %v3901_v61 = vld [vmem:[#allocation8 + $0x244] ss:$8 sps:$4 sm:$0xff]  }
 0x1be   : > { %1509 = vmatpush1.bf16.msra.mxu1 %v4835_v55 }
 0x1bf   : > { %1718 = vmatpush1.bf16.msra.mxu0 %v4835_v55  ;;  %1510 = vmatprep.subr.bf16.mxu1 %v4841_v49  ;;  %v3896_v55 = vld [vmem:[#allocation8 + $0x210] ss:$8 sps:$4 sm:$0xff]  }
 0x1c0   : > { %1719 = vmatprep.subr.bf16.mxu0 %v4841_v49  ;;  %v3893_v49 = vld [vmem:[#allocation8 + $0x204] ss:$8 sps:$4 sm:$0xff]  }
 0x1c2   : > { %1511 = vmatpush1.bf16.msra.mxu1 %v4847_v59 }
 0x1c3   : > { %1720 = vmatpush1.bf16.msra.mxu0 %v4847_v59  ;;  %1512 = vmatprep.subr.bf16.mxu1 %v4853_v57  ;;  %v5826_v59 = vld [vmem:[#allocation40_spill] sm:$0xff] }
 0x1c4   : > { %1721 = vmatprep.subr.bf16.mxu0 %v4853_v57  ;;  %v5827_v57 = vld [vmem:[#allocation41_spill] sm:$0xff] }
 0x1c6   : > { %1513 = vmatpush1.bf16.msra.mxu1 %v4859_v48 }
 0x1c7   : > { %1722 = vmatpush1.bf16.msra.mxu0 %v4859_v48  ;;  %1514 = vmatprep.subr.bf16.mxu1 %v4865_v52  ;;  %v5828_v48 = vld [vmem:[#allocation42_spill] sm:$0xff] }
 0x1c8   : > { %1723 = vmatprep.subr.bf16.mxu0 %v4865_v52  ;;  %v1661_v52 = vpack.c.bf16 %v1652_v47, %v1652_v47 }
 0x1ca   : > { %1515 = vmatpush1.bf16.msra.mxu1 %v5802_v20 }
 0x1cb   : > { %1724 = vmatpush1.bf16.msra.mxu0 %v5802_v20  ;;  %1516 = vmatprep.subr.bf16.mxu1 %v5803_v22  ;;  %v1452_v20 = vpack.c.bf16 %v1444_v12, %v1436_v10 }
 0x1cc   : > { %1725 = vmatprep.subr.bf16.mxu0 %v5803_v22  ;;  %v1663_v22 = vpack.c.bf16 %v1654_v14, %v1654_v14 }
 0x1ce   : > { %1517 = vmatpush1.bf16.msra.mxu1 %v5804_v24 }
 0x1cf   : > { %1726 = vmatpush1.bf16.msra.mxu0 %v5804_v24  ;;  %1518 = vmatprep.subr.bf16.mxu1 %v5805_v26  ;;  %v5833_v24 = vld [vmem:[#allocation46_spill] sm:$0xff] }
 0x1d0   : > { %1727 = vmatprep.subr.bf16.mxu0 %v5805_v26  ;;  %v5834_v26 = vld [vmem:[#allocation47_spill] sm:$0xff] }
 0x1d2   : > { %1519 = vmatpush1.bf16.msra.mxu1 %v5806_v28 }
 0x1d3   : > { %1728 = vmatpush1.bf16.msra.mxu0 %v5806_v28  ;;  %1520 = vmatprep.subr.bf16.mxu1 %v5807_v30  ;;  %v1416_v28 = vlaneseq }
 0x1d4   : > { %1729 = vmatprep.subr.bf16.mxu0 %v5807_v30  ;;  %v5835_v30 = vld [vmem:[#allocation48_spill] sm:$0xff] }
 0x1d6   : > { %1521 = vmatpush1.bf16.msra.mxu1 %v5808_v31 }
 0x1d7   : > { %1730 = vmatpush1.bf16.msra.mxu0 %v5808_v31  ;;  %1522 = vmatprep.subr.bf16.mxu1 %v5809_v32  ;;  %v5836_v31 = vld [vmem:[#allocation49_spill] sm:$0xff] }
 0x1d8   : > { %1731 = vmatprep.subr.bf16.mxu0 %v5809_v32  ;;  %v5152_v32 = vshrl.u32 %v1416_v28, 7 }
 0x1da   : > { %1523 = vmatpush1.bf16.msra.mxu1 %v5810_v33 }
 0x1db   : > { %1732 = vmatpush1.bf16.msra.mxu0 %v5810_v33  ;;  %1524 = vmatprep.subr.bf16.mxu1 %v5811_v34  ;;  %v5837_v33 = vld [vmem:[#allocation50_spill] sm:$0xff] }
 0x1dc   : > { %1733 = vmatprep.subr.bf16.mxu0 %v5811_v34  ;;  %v1418_v34 = vstv %s3090_s17 }
 0x1dd   : > { %v1419_v36 = vadd.s32 %v1418_v34, %v5152_v32 }
 0x1de   : > { %1525 = vmatpush1.bf16.msra.mxu1 %v5812_v35 }
 0x1df   : > { %1734 = vmatpush1.bf16.msra.mxu0 %v5812_v35  ;;  %1526 = vmatprep.subr.bf16.mxu1 %v4937_v29  ;;  %v5838_v35 = vld [vmem:[#allocation51_spill] sm:$0xff]  ;;  %vm1420_vm0 = vcmp.ge.s32.totalorder %v1419_v36, 0  ;;  %vm1421_vm1 = vcmp.lt.s32.totalorder %v1419_v36, 40 }
 0x1e0   : > { %1735 = vmatprep.subr.bf16.mxu0 %v4937_v29  ;;  %v3895_v29 = vld [vmem:[#allocation8 + $0x214] ss:$8 sps:$4 sm:$0xff]   ;;  %vm5167_vm2 = vmand %vm1420_vm0, %vm1421_vm1  ;;  %vm1941_vm0 = vcmask 1043456   ;;  %vm1909_vm1 = vcmask 1044480  }
 0x1e2   : > { %1527 = vmatpush1.bf16.msra.mxu1 %v4941_v43 }
 0x1e3   : > { %1736 = vmatpush1.bf16.msra.mxu0 %v4941_v43  ;;  %1539 = vmatprep.subr.bf16.mxu1 %v3893_v49  ;;  %v3898_v43 = vld [vmem:[#allocation8 + $0x220] ss:$8 sps:$4 sm:$0xff]  }
 0x1e4   : > { %1746 = vmatprep.subr.bf16.mxu0 %v3893_v49 }
 0x1e5   : > { %1529 = vmatmul.mubr.bf16.vlgmr.msra.gmra.mrb[4].mxu1 %v1447_v40  ;;  %v5841_v40 = vld [vmem:[#allocation54_spill] sm:$0xff] }
 0x1e6   : > { %1738 = vmatmul.mubr.bf16.vlgmr.msra.gmra.mrb[4].mxu0 %v1658_v41  ;;  %1540 = vmatpush1.bf16.msra.mxu1 %v3894_v54  ;;  %v5842_v41 = vld [vmem:[#allocation55_spill] sm:$0xff] }
 0x1e7   : > { %1747 = vmatpush1.bf16.msra.mxu0 %v3894_v54  ;;  %1541 = vmatprep.subr.bf16.mxu1 %v3895_v29 }
 0x1e8   : > { %1748 = vmatprep.subr.bf16.mxu0 %v3895_v29  ;;  %1571 = vmatprep.mubr.bf16.mxu1 %v1450_v51 }
 0x1e9   : > { %1778 = vmatprep.mubr.bf16.mxu0 %v1661_v52 }
 0x1ea   : > { %1542 = vmatpush1.bf16.msra.mxu1 %v3896_v55 }
 0x1eb   : > { %1749 = vmatpush1.bf16.msra.mxu0 %v3896_v55  ;;  %1543 = vmatprep.subr.bf16.mxu1 %v3897_v56 }
 0x1ec   : > { %1750 = vmatprep.subr.bf16.mxu0 %v3897_v56  ;;  %v5845_v56 = vld [vmem:[#allocation56_spill] sm:$0xff] }
 0x1ee   : > { %1544 = vmatpush1.bf16.msra.mxu1 %v3898_v43 }
 0x1ef   : > { %1751 = vmatpush1.bf16.msra.mxu0 %v3898_v43  ;;  %1545 = vmatprep.subr.bf16.mxu1 %v3899_v58 }
 0x1f0   : > { %1752 = vmatprep.subr.bf16.mxu0 %v3899_v58 }
 0x1f2   : > { %1546 = vmatpush1.bf16.msra.mxu1 %v3900_v60 }
 0x1f3   : > { %1753 = vmatpush1.bf16.msra.mxu0 %v3900_v60  ;;  %1547 = vmatprep.subr.bf16.mxu1 %v3901_v61 }
 0x1f4   : > { %1754 = vmatprep.subr.bf16.mxu0 %v3901_v61  ;;  %v5846_v61 = vld [vmem:[#allocation57_spill] sm:$0xff] }
 0x1f6   : > { %1548 = vmatpush1.bf16.msra.mxu1 %v3902_v62 }
 0x1f7   : > { %1755 = vmatpush1.bf16.msra.mxu0 %v3902_v62  ;;  %1549 = vmatprep.subr.bf16.mxu1 %v3903_v63 }
 0x1f8   : > { %1756 = vmatprep.subr.bf16.mxu0 %v3903_v63  ;;  %v5847_v63 = vld [vmem:[#allocation58_spill] sm:$0xff] }
 0x1fa   : > { %1550 = vmatpush1.bf16.msra.mxu1 %v3904_v1 }
 0x1fb   : > { %1757 = vmatpush1.bf16.msra.mxu0 %v3904_v1  ;;  %1551 = vmatprep.subr.bf16.mxu1 %v3905_v3  ;;  %v5848_v1 = vld [vmem:[#allocation59_spill] sm:$0xff] }
 0x1fc   : > { %1758 = vmatprep.subr.bf16.mxu0 %v3905_v3  ;;  %v5849_v3 = vld [vmem:[#allocation60_spill] sm:$0xff] }
 0x1fe   : > { %1552 = vmatpush1.bf16.msra.mxu1 %v3906_v5 }
 0x1ff   : > { %1759 = vmatpush1.bf16.msra.mxu0 %v3906_v5  ;;  %1553 = vmatprep.subr.bf16.mxu1 %v5813_v7  ;;  %v5850_v5 = vld [vmem:[#allocation61_spill] sm:$0xff] }
 0x200   : > { %1760 = vmatprep.subr.bf16.mxu0 %v5813_v7  ;;  %v5851_v7 = vld [vmem:[#allocation62_spill] sm:$0xff] }
 0x202   : > { %1554 = vmatpush1.bf16.msra.mxu1 %v5814_v9 }
 0x203   : > { %1761 = vmatpush1.bf16.msra.mxu0 %v5814_v9  ;;  %1555 = vmatprep.subr.bf16.mxu1 %v5815_v15  ;;  %v5852_v9 = vld [vmem:[#allocation63_spill] sm:$0xff] }
 0x204   : > { %1762 = vmatprep.subr.bf16.mxu0 %v5815_v15  ;;  %v5853_v15 = vld [vmem:[#allocation65_spill] sm:$0xff] }
 0x206   : > { %1556 = vmatpush1.bf16.msra.mxu1 %v5816_v17 }
 0x207   : > { %1763 = vmatpush1.bf16.msra.mxu0 %v5816_v17  ;;  %1557 = vmatprep.subr.bf16.mxu1 %v5817_v19  ;;  %v5854_v17 = vld [vmem:[#allocation67_spill] sm:$0xff] }
 0x208   : > { %1764 = vmatprep.subr.bf16.mxu0 %v5817_v19  ;;  %v5855_v19 = vld [vmem:[#allocation69_spill] sm:$0xff] }
 0x20a   : > { %1558 = vmatpush1.bf16.msra.mxu1 %v5818_v25 }
 0x20b   : > { %1765 = vmatpush1.bf16.msra.mxu0 %v5818_v25  ;;  %1559 = vmatprep.subr.bf16.mxu1 %v5819_v27  ;;  %v5856_v25 = vld [vmem:[#allocation71_spill] sm:$0xff] }
 0x20c   : > { %1766 = vmatprep.subr.bf16.mxu0 %v5819_v27  ;;  %v5857_v27 = vld [vmem:[#allocation73_spill] sm:$0xff] }
 0x20e   : > { %1560 = vmatpush1.bf16.msra.mxu1 %v5820_v46 }
 0x20f   : > { %1767 = vmatpush1.bf16.msra.mxu0 %v5820_v46  ;;  %1561 = vmatprep.subr.bf16.mxu1 %v5821_v50  ;;  %v5858_v46 = vld [vmem:[#allocation75_spill] sm:$0xff] }
 0x210   : > { %1768 = vmatprep.subr.bf16.mxu0 %v5821_v50  ;;  %v5859_v50 = vld [vmem:[#allocation77_spill] sm:$0xff] }
 0x212   : > { %1562 = vmatpush1.bf16.msra.mxu1 %v5822_v11 }
 0x213   : > { %1769 = vmatpush1.bf16.msra.mxu0 %v5822_v11  ;;  %1563 = vmatprep.subr.bf16.mxu1 %v5823_v13  ;;  %v5860_v11 = vld [vmem:[#allocation79_spill] sm:$0xff] }
 0x214   : > { %1770 = vmatprep.subr.bf16.mxu0 %v5823_v13  ;;  %v5861_v13 = vld [vmem:[#allocation81_spill] sm:$0xff] }
 0x216   : > { %1564 = vmatpush1.bf16.msra.mxu1 %v5824_v21 }
 0x217   : > { %1771 = vmatpush1.bf16.msra.mxu0 %v5824_v21  ;;  %1565 = vmatprep.subr.bf16.mxu1 %v5825_v23  ;;  %v5862_v21 = vld [vmem:[#allocation83_spill] sm:$0xff] }
 0x218   : > { %1772 = vmatprep.subr.bf16.mxu0 %v5825_v23  ;;  %v5863_v23 = vld [vmem:[#allocation85_spill] sm:$0xff] }
 0x21a   : > { %1566 = vmatpush1.bf16.msra.mxu1 %v5826_v59 }
 0x21b   : > { %1773 = vmatpush1.bf16.msra.mxu0 %v5826_v59  ;;  %1567 = vmatprep.subr.bf16.mxu1 %v5827_v57  ;;  %v1435_v59 = vld [vmem:[%s4578_s5 + $0x30] sm:$0xff] }
 0x21c   : > { %1774 = vmatprep.subr.bf16.mxu0 %v5827_v57  ;;  %v1443_v57 = vld [vmem:[%s4578_s5 + $0x70] sm:$0xff] }
 0x21d   : > { %v1451_v53 = vpack.c.bf16 %v1443_v57, %v1435_v59 }
 0x21e   : > { %1568 = vmatpush1.bf16.msra.mxu1 %v5828_v48 }
 0x21f   : > { %1775 = vmatpush1.bf16.msra.mxu0 %v5828_v48  ;;  %1569 = vmatprep.subr.bf16.mxu1 %v5829_v4  ;;  %v1653_v48 = vld [vmem:[%s4593_s21 + $0x30] sm:$0xff] }
 0x220   : > { %1776 = vmatprep.subr.bf16.mxu0 %v5829_v4  ;;  %v1662_v0 = vpack.c.bf16 %v1653_v48, %v1653_v48  ;;  %v1828_v4 = vstv %s1655_s30 }
 0x221   : > { %v1829_v10 = vadd.s32 %v1828_v4, %v5152_v32 }
 0x222   : > { %1570 = vmatpush1.bf16.msra.mxu1 %v5831_v16 }
 0x223   : > { %1777 = vmatpush1.bf16.msra.mxu0 %v5831_v16  ;;  %1582 = vmatprep.subr.bf16.mxu1 %v5832_v18  ;;  %vm1830_vm5 = vcmp.ge.s32.totalorder %v1829_v10, 0  ;;  %vm1831_vm6 = vcmp.lt.s32.totalorder %v1829_v10, 40 }
 0x224   : > { %1787 = vmatprep.subr.bf16.mxu0 %v5832_v18  ;;  %vm5232_vm10 = vmand %vm1830_vm5, %vm1831_vm6 }
 0x225   : > { %1572 = vmatmul.mubr.bf16.vlgmr.msra.gmra.mrb[4].mxu1 %v1449_v6  ;;  %v5223_v6 = vadd.s32 8, %v5152_v32 }
 0x226   : > { %1779 = vmatmul.mubr.bf16.vlgmr.msra.gmra.mrb[4].mxu0 %v1660_v8  ;;  %1583 = vmatpush1.bf16.msra.mxu1 %v5833_v24  ;;  %v1627_v8 = vadd.s32 %v1626_v2, %v5152_v32 }
 0x227   : > { %1788 = vmatpush1.bf16.msra.mxu0 %v5833_v24  ;;  %1584 = vmatprep.subr.bf16.mxu1 %v5834_v26 }
 0x228   : > { %1789 = vmatprep.subr.bf16.mxu0 %v5834_v26  ;;  %1614 = vmatprep.mubr.bf16.mxu1 %v1452_v20  ;;  %vm1629_vm3 = vcmp.ge.s32.totalorder %v1627_v8, 0  ;;  %vm1631_vm4 = vcmp.lt.s32.totalorder %v1627_v8, 40 }
 0x229   : > { %1819 = vmatprep.mubr.bf16.mxu0 %v1663_v22  ;;  %vm5228_vm7 = vmand %vm1629_vm3, %vm1631_vm4 }
 0x22a   : > { %1585 = vmatpush1.bf16.msra.mxu1 %v5835_v30 }
 0x22b   : > { %1790 = vmatpush1.bf16.msra.mxu0 %v5835_v30  ;;  %1586 = vmatprep.subr.bf16.mxu1 %v5836_v31 }
 0x22c   : > { %1791 = vmatprep.subr.bf16.mxu0 %v5836_v31 }
 0x22e   : > { %1587 = vmatpush1.bf16.msra.mxu1 %v5837_v33 }
 0x22f   : > { %1792 = vmatpush1.bf16.msra.mxu0 %v5837_v33  ;;  %1588 = vmatprep.subr.bf16.mxu1 %v5838_v35 }
 0x230   : > { %1793 = vmatprep.subr.bf16.mxu0 %v5838_v35 }
 0x232   : > { %1589 = vmatpush1.bf16.msra.mxu1 %v5839_v37 }
 0x233   : > { %1794 = vmatpush1.bf16.msra.mxu0 %v5839_v37  ;;  %1590 = vmatprep.subr.bf16.mxu1 %v5840_v38 }
 0x234   : > { %1795 = vmatprep.subr.bf16.mxu0 %v5840_v38 }
 0x236   : > { %1591 = vmatpush1.bf16.msra.mxu1 %v5841_v40 }
 0x237   : > { %1796 = vmatpush1.bf16.msra.mxu0 %v5841_v40  ;;  %1592 = vmatprep.subr.bf16.mxu1 %v5842_v41 }
 0x238   : > { %1797 = vmatprep.subr.bf16.mxu0 %v5842_v41  ;;  %v1327_v42 = vpop.f32.mrb[0].mxu1 }
 0x239   : > { %v1409_v44 = vpop.f32.mrb[0].mxu0  ;;  %v1329_v51 = vpop.f32.mrb[1].mxu1 }
 0x23a   : > { %v3444_v49 = vadd.f32 %v1409_v44, %v1327_v42  ;;  %v1411_v52 = vpop.f32.mrb[1].mxu0  ;;  %v1331_v29 = vpop.f32.mrb[2].mxu1  ;;  %1593 = vmatpush1.bf16.msra.mxu1 %v5845_v56 }
 0x23b   : > { %v3445_v54 = vadd.f32 %v1411_v52, %v1329_v51  ;;  %v1413_v55 = vpop.f32.mrb[2].mxu0  ;;  %1798 = vmatpush1.bf16.msra.mxu0 %v5845_v56  ;;  %v1332_v58 = vpop.f32.mrb[3].mxu1  ;;  %1594 = vmatprep.subr.bf16.mxu1 %v5846_v61 }
 0x23c   : > { %v1425_v43 = vsel %vm5167_vm2, %v3444_v49, 0.0  ;;  %v1414_v60 = vpop.f32.mrb[3].mxu0  ;;  %1799 = vmatprep.subr.bf16.mxu0 %v5846_v61 }
 0x23d   : > { %1427 = vst [vmem:[#allocation2] sm:$0xff] %v1425_v43  ;;  %v1426_v62 = vsel %vm5167_vm2, %v3445_v54, 0.0 }
 0x23e   : > { %1428 = vst [vmem:[#allocation2 + $0x8] sm:$0xff] %v1426_v62  ;;  %1595 = vmatpush1.bf16.msra.mxu1 %v5847_v63 }
 0x23f   : > { %1800 = vmatpush1.bf16.msra.mxu0 %v5847_v63  ;;  %1596 = vmatprep.subr.bf16.mxu1 %v5848_v1 }
 0x240   : > { %1801 = vmatprep.subr.bf16.mxu0 %v5848_v1 }
 0x242   : > { %1597 = vmatpush1.bf16.msra.mxu1 %v5849_v3 }
 0x243   : > { %1802 = vmatpush1.bf16.msra.mxu0 %v5849_v3  ;;  %1598 = vmatprep.subr.bf16.mxu1 %v5850_v5 }
 0x244   : > { %1803 = vmatprep.subr.bf16.mxu0 %v5850_v5  ;;  %v1847_v14 = vld [vmem:[#allocation2] sm:$0xfc] }
 0x245   : > { %v1877_v22 = vld [vmem:[#allocation2] sm:$0xf8]  ;;  %v1854_v31 = vrot.slane %v1847_v14, 1 }
 0x246   : > { %1599 = vmatpush1.bf16.msra.mxu1 %v5851_v7  ;;  %v1882_v49 = vrot.slane %v1877_v22, 2  ;;  %v1905_v55 = vld [vmem:[#allocation2] sm:$0xf0] }
 0x247   : > { %1804 = vmatpush1.bf16.msra.mxu0 %v5851_v7  ;;  %1600 = vmatprep.subr.bf16.mxu1 %v5852_v9  ;;  %v1910_v5 = vrot.slane %v1905_v55, 3  ;;  %v2070_v22 = vld [vmem:[%s5870_s23 + $0x20] sm:$0xff] }
 0x248   : > { %1805 = vmatprep.subr.bf16.mxu0 %v5852_v9  ;;  %v1957_v9 = vld [vmem:[#allocation2 + $0x8] sm:$0xc0] }
 0x24a   : > { %1601 = vmatpush1.bf16.msra.mxu1 %v5853_v15 }
 0x24b   : > { %1806 = vmatpush1.bf16.msra.mxu0 %v5853_v15  ;;  %1602 = vmatprep.subr.bf16.mxu1 %v5854_v17 }
 0x24c   : > { %1807 = vmatprep.subr.bf16.mxu0 %v5854_v17 }
 0x24e   : > { %1603 = vmatpush1.bf16.msra.mxu1 %v5855_v19 }
 0x24f   : > { %1808 = vmatpush1.bf16.msra.mxu0 %v5855_v19  ;;  %1604 = vmatprep.subr.bf16.mxu1 %v5856_v25  ;;  %v1962_v19 = vrot.slane %v1957_v9, 5 }
 0x250   : > { %1809 = vmatprep.subr.bf16.mxu0 %v5856_v25 }
 0x252   : > { %1605 = vmatpush1.bf16.msra.mxu1 %v5857_v27 }
 0x253   : > { %1810 = vmatpush1.bf16.msra.mxu0 %v5857_v27  ;;  %1606 = vmatprep.subr.bf16.mxu1 %v5858_v46  ;;  %v1985_v27 = vld [vmem:[#allocation2 + $0x8] sm:$0x80] }
 0x254   : > { %1811 = vmatprep.subr.bf16.mxu0 %v5858_v46 }
 0x256   : > { %1607 = vmatpush1.bf16.msra.mxu1 %v5859_v50 }
 0x257   : > { %1812 = vmatpush1.bf16.msra.mxu0 %v5859_v50  ;;  %1608 = vmatprep.subr.bf16.mxu1 %v5860_v11 }
 0x258   : > { %1813 = vmatprep.subr.bf16.mxu0 %v5860_v11  ;;  %v1990_v11 = vrot.slane %v1985_v27, 6 }
 0x25a   : > { %1609 = vmatpush1.bf16.msra.mxu1 %v5861_v13 }
 0x25b   : > { %1814 = vmatpush1.bf16.msra.mxu0 %v5861_v13  ;;  %1610 = vmatprep.subr.bf16.mxu1 %v5862_v21 }
 0x25c   : > { %1815 = vmatprep.subr.bf16.mxu0 %v5862_v21 }
 0x25e   : > { %1611 = vmatpush1.bf16.msra.mxu1 %v5863_v23 }
 0x25f   : > { %1816 = vmatpush1.bf16.msra.mxu0 %v5863_v23  ;;  %1612 = vmatprep.subr.bf16.mxu1 %v4939_v39 }
 0x260   : > { %1817 = vmatprep.subr.bf16.mxu0 %v4939_v39  ;;  %v1628_v39 = vadd.s32 %v1626_v2, %v5223_v6 }
 0x262   : > { %1613 = vmatpush1.bf16.msra.mxu1 %v4945_v45  ;;  %vm1630_vm8 = vcmp.ge.s32.totalorder %v1628_v39, 0  ;;  %vm1632_vm9 = vcmp.lt.s32.totalorder %v1628_v39, 40 }
 0x263   : > { %1818 = vmatpush1.bf16.msra.mxu0 %v4945_v45  ;;  %vm5236_vm11 = vmand %vm1630_vm8, %vm1632_vm9 }
 0x265   : > { %1615 = vmatmul.mubr.bf16.vlgmr.msra.gmra.mrb[4].mxu1 %v1451_v53 }
 0x266   : > { %1820 = vmatmul.mubr.bf16.vlgmr.msra.gmra.mrb[4].mxu0 %v1662_v0 }
 0x338   : > { %v1616_v16 = vpop.f32.mrb[4].mxu1 }
 0x339   : > { %v1821_v18 = vpop.f32.mrb[4].mxu0  ;;  %v5242_v24 = vsel %vm5228_vm7, %v1616_v16, 0.0  ;;  %v1618_v28 = vpop.f32.mrb[5].mxu1  ;;  %v2078_v16 = vld [vmem:[%s5870_s23 + $0x60] sm:$0xff] }
 0x33a   : > { %v1835_v26 = vsel %vm5232_vm10, %v1821_v18, 0.0  ;;  %v1823_v30 = vpop.f32.mrb[5].mxu0  ;;  %v5248_v33 = vsel %vm5228_vm7, %v1618_v28, 0.0  ;;  %v1620_v35 = vpop.f32.mrb[6].mxu1  ;;  %v1855_v37 = vrot.slane %v5242_v24, 1  ;;  %v1883_v47 = vrot.slane %v5242_v24, 2 }
 0x33b   : > { %1837 = vst [vmem:[#allocation2 + $0x30] sm:$0xff] %v1835_v26  ;;  %v1836_v34 = vsel %vm5232_vm10, %v1823_v30, 0.0  ;;  %v1825_v36 = vpop.f32.mrb[6].mxu0  ;;  %v5255_v38 = vsel %vm5236_vm11, %v1620_v35, 0.0  ;;  %v1622_v40 = vpop.f32.mrb[7].mxu1  ;;  %v1963_v51 = vrot.slane %v5248_v33, 5 }
 0x33c   : > { %1838 = vst [vmem:[#allocation2 + $0x38] sm:$0xff] %v1836_v34  ;;  %v1826_v41 = vpop.f32.mrb[7].mxu0  ;;  %v5259_v42 = vsel %vm5236_vm11, %v1622_v40, 0.0  ;;  %v1856_v44 = vsel %vm1853_vm12, %v1854_v31, %v1855_v37  ;;  %v1991_v52 = vrot.slane %v5248_v33, 6  ;;  %v1943_v56 = vrot.slane %v5248_v33, 4  ;;  %v2079_v18 = vld [vmem:[%s5870_s23 + $0x68] sm:$0xff] }
 0x33d   : > { %1861 = vrot.lane.b32.xlu0 %v1856_v44, %s4219_s20  ;;  %v1965_v54 = vrot.slane %v5259_v42, 5  ;;  %v1993_v29 = vrot.slane %v5259_v42, 6  ;;  %v1945_v43 = vrot.slane %v5259_v42, 4  ;;  %v1884_v58 = vsel %vm1881_vm13, %v1882_v49, %v1883_v47  ;;  %v2071_v26 = vld [vmem:[%s5870_s23 + $0x28] sm:$0xff]  ;;  %v2080_v30 = vld [vmem:[%s5870_s23 + $0x70] sm:$0xff]  ;;  %v2081_v31 = vld [vmem:[%s5870_s23 + $0x78] sm:$0xff] }
 0x33e   : > { %v1911_v60 = vrot.slane %v5242_v24, 3  ;;  %v1964_v46 = vsel %vm1961_vm14, %v1962_v19, %v1963_v51  ;;  %v1857_v21 = vrot.slane %v5255_v38, 1  ;;  %v1992_v23 = vsel %vm1989_vm15, %v1990_v11, %v1991_v52  ;;  %v2072_v34 = vld [vmem:[%s5870_s23 + $0x30] sm:$0xff]  ;;  %v2073_v36 = vld [vmem:[%s5870_s23 + $0x38] sm:$0xff]  ;;  %v2083_v40 = vld [vmem:[%s5870_s23 + $0x88] sm:$0xff] }
 0x33f   : > { %v1966_v61 = vsel %vm1961_vm14, %v1963_v51, %v1965_v54  ;;  %v1994_v62 = vsel %vm1989_vm15, %v1991_v52, %v1993_v29  ;;  %v5280_v1 = vsel %vm1941_vm0, %v1943_v56, %v1945_v43  ;;  %v1885_v48 = vrot.slane %v5255_v38, 2  ;;  %v2067_v49 = vld [vmem:[%s5870_s23 + $0x8] sm:$0xff] }
 0x340   : > { %v1912_v15 = vsel %vm1909_vm1, %v1910_v5, %v1911_v60  ;;  %v1858_v57 = vsel %vm1853_vm12, %v1855_v37, %v1857_v21  ;;  %v1913_v2 = vrot.slane %v5255_v38, 3  ;;  %v3412_v20 = vpack.c.bf16 %v2079_v18, %v2078_v16  ;;  %v2082_v37 = vld [vmem:[%s5870_s23 + $0x80] sm:$0xff] }
 0x341   : > { %1889 = vrot.lane.b32.xlu0 %v1884_v58, %s4220_s28  ;;  %v1886_v4 = vsel %vm1881_vm13, %v1883_v47, %v1885_v48  ;;  %v3388_v28 = vpack.c.bf16 %v2071_v26, %v2070_v22  ;;  %v3416_v35 = vpack.c.bf16 %v2081_v31, %v2080_v30  ;;  %v3392_v41 = vpack.c.bf16 %v2073_v36, %v2072_v34  ;;  %v2066_v47 = vld [vmem:[%s5870_s23] sm:$0xff] }
 0x342   : > { %v1848_v63 = vld [vmem:[#allocation2 + $0x30] sm:$0x3]  ;;  %v1914_v39 = vsel %vm1909_vm1, %v1911_v60, %v1913_v2  ;;  %3413 = vmatprep.subr.bf16.mxu1 %v3412_v20  ;;  %v5343_v44 = vpack.c.bf16 %v2083_v40, %v2082_v37  ;;  %v5352_v51 = vpack.c.bf16 %v2067_v49, %v2066_v47  ;;  %v3219_v18 = vld [vmem:[%s5871_s18] ss:$0 sm:$0xff]  ;;  %v2029_v36 = vadd.s32 16, %v5152_v32  ;;  %s5877_s18 = sld [smem:[#allocation25_spill]] }
 0x343   : > { %v1859_v3 = vrot.slane %v1848_v63, 1  ;;  %v1878_v7 = vld [vmem:[#allocation2 + $0x30] sm:$0x7]  ;;  %v1958_v13 = vld [vmem:[#allocation2 + $0x38] sm:$0x3f]  ;;  %3389 = vmatprep.subr.bf16.mxu0 %v3388_v28  ;;  %3415 = vmatpush3.bf16.msra.mxu1 %v3412_v20  ;;  %vm2102_vm10 = vcmask 261120  }
 0x344   : > { %v1887_v17 = vrot.slane %v1878_v7, 2  ;;  %v1906_v25 = vld [vmem:[#allocation2 + $0x30] sm:$0xf]  ;;  %v1967_v59 = vrot.slane %v1958_v13, 5  ;;  %v1986_v10 = vld [vmem:[#allocation2 + $0x38] sm:$0x7f]  ;;  %3391 = vmatpush3.bf16.msra.mxu0 %v3388_v28  ;;  %3417 = vmatprep.subr.bf16.mxu1 %v3416_v35 }
 0x345   : > { %1867 = vrot.lane.b32.xlu1 %v1859_v3, %s4219_s20  ;;  %1917 = vrot.lane.b32.xlu0 %v1912_v15, %s4221_s25  ;;  %v1915_v50 = vrot.slane %v1906_v25, 3  ;;  %v1860_v53 = vsel %vm1853_vm12, %v1857_v21, %v1859_v3  ;;  %v1995_v12 = vrot.slane %v1986_v10, 6  ;;  %v1839_v63 = vld [vmem:[#allocation2] sm:$0xfe]  ;;  %v1933_v15 = vld [vmem:[#allocation2 + $0x8] sm:$0xe0] }
 0x346   : > { %v1888_v0 = vsel %vm1881_vm13, %v1885_v48, %v1887_v17  ;;  %v1968_v45 = vsel %vm1961_vm14, %v1965_v54, %v1967_v59  ;;  %3393 = vmatprep.subr.bf16.mxu0 %v3392_v41  ;;  %vm2610_vm11 = vcmask 1040384  }
 0x347   : > { %v1916_v8 = vsel %vm1909_vm1, %v1913_v2, %v1915_v50  ;;  %v1996_v14 = vsel %vm1989_vm15, %v1993_v29, %v1995_v12  ;;  %3419 = vmatpush3.bf16.msra.mxu1 %v3416_v35 }
 0x348   : > { %3395 = vmatpush3.bf16.msra.mxu0 %v3392_v41  ;;  %3421 = vmatprep.subr.bf16.mxu1 %v5343_v44  ;;  %p5878_p7 = scmp.ne.s32.totalorder %s5877_s18, 0 }
 0x349   : > { %1895 = vrot.lane.b32.xlu1 %v1887_v17, %s4220_s28  ;;  %1969 = vrot.lane.b32.xlu0 %v1964_v46, %s4219_s20  ;;  %v1936_v17 = vld [vmem:[#allocation2 + $0x38] sm:$0x1f]  ;;  %s5880_s11 = sld [smem:[#allocation18_spill]] (%p5878_p7)  ;;  %s5881_s5 = sld [smem:[#allocation90_spill]] (%p5878_p7) }
 0x34a   : > { %3397 = vmatprep.subr.bf16.mxu0 %v5352_v51  ;;  %v1947_v11 = vrot.slane %v1936_v17, 4 }
 0x34d   : > { %1923 = vrot.lane.b32.xlu1 %v1915_v50, %s4221_s25  ;;  %1997 = vrot.lane.b32.xlu0 %v1992_v23, %s4220_s28  ;;  %v1942_v50 = vrot.slane %v1933_v15, 4 }
 0x34f   : > { %v1944_v21 = vsel %vm1941_vm0, %v1942_v50, %v1943_v56  ;;  %s3493_s15 = smul.u32 (%p5878_p7), 5, %s5880_s11 }
 0x351   : > { %1975 = vrot.lane.b32.xlu1 %v1967_v59, %s4219_s20  ;;  %1863 = vrot.lane.b32.xlu0 %v1858_v57, %s4219_s20 }
 0x355   : > { %1865 = vrot.lane.b32.xlu1 %v1860_v53, %s4219_s20  ;;  %1893 = vrot.lane.b32.xlu0 %v1888_v0, %s4220_s28  ;;  %v1842_v53 = vld [vmem:[#allocation2 + $0x30] sm:$0x1] }
 0x359   : > { %1891 = vrot.lane.b32.xlu1 %v1886_v4, %s4220_s28  ;;  %1921 = vrot.lane.b32.xlu0 %v1916_v8, %s4221_s25 }
 0x35d   : > { %1919 = vrot.lane.b32.xlu1 %v1914_v39, %s4221_s25  ;;  %1973 = vrot.lane.b32.xlu0 %v1968_v45, %s4219_s20 }
 0x361   : > { %1971 = vrot.lane.b32.xlu1 %v1966_v61, %s4219_s20  ;;  %2001 = vrot.lane.b32.xlu0 %v1996_v14, %s4220_s28 }
 0x365   : > { %1999 = vrot.lane.b32.xlu1 %v1994_v62, %s4220_s28 }
 0x369   : > { %2003 = vrot.lane.b32.xlu1 %v1995_v12, %s4220_s28  ;;  %s3220_s28 = sadd.s32 4294967292, %s5145_s27  ;;  %s5879_s27 = sld [smem:[#allocation17_spill]] (%p5878_p7) }
 0x36a   : > { %v2030_v12 = vstv %s3220_s28  ;;  %s5876_s28 = sld [smem:[#allocation89_spill]] }
 0x36b   : > { %v2031_v26 = vadd.s32 %v2030_v12, %v5152_v32 }
 0x36d   : > { %vm2034_vm4 = vcmp.ge.s32.totalorder %v2031_v26, 0  ;;  %vm2037_vm5 = vcmp.lt.s32.totalorder %v2031_v26, 40 }
 0x36e   : > { %vm5372_vm6 = vmand %vm2034_vm4, %vm2037_vm5 }
 0x36f   : > { %s3237_s21 = sshll.u32 (%p5878_p7), %s5879_s27, 1 }
 0x370   : > { %s2739_s4 = ssub.s32 (%p5878_p7), 5, %s3237_s21  ;;  %s2745_s17 = sadd.s32 (%p5878_p7), %s3493_s15, %s3237_s21 }
 0x371   : > { %p2740_p10 = scmp.lt.s32.totalorder (%p5878_p7), %s2739_s4, 2  ;;  %s3240_s30 = sshll.u32 (%p5878_p7), %s2745_s17, 3 }
 0x372   : > { %s5488_s6 = scalar_lea.vmem (%p5878_p7), %s5881_s5, %s3240_s30  }
 0x3af   : > { %v1862_v52 = vpop.permute.xlu0 %1861 }
 0x3b0   : > { %v1873_v5 = vadd.f32 %v1862_v52, %v1839_v63  ;;  %v2033_v52 = vadd.s32 %v2030_v12, %v2029_v36 }
 0x3b2   : > { %vm2036_vm8 = vcmp.ge.s32.totalorder %v2033_v52, 0  ;;  %vm2039_vm9 = vcmp.lt.s32.totalorder %v2033_v52, 40 }
 0x3b3   : > { %v1890_v54 = vpop.permute.xlu0 %1889 }
 0x3b4   : > { %v1901_v9 = vadd.f32 %v1890_v54, %v1873_v5  ;;  %v2068_v5 = vld [vmem:[%s5870_s23 + $0x10] sm:$0xff]  ;;  %v2089_v54 = vld [vmem:[%s5870_s23 + $0xb8] sm:$0xff] }
 0x3b7   : > { %v1868_v29 = vpop.permute.xlu1 %1867  ;;  %v1918_v55 = vpop.permute.xlu0 %1917 }
 0x3b8   : > { %v1929_v25 = vadd.f32 %v1918_v55, %v1901_v9  ;;  %v1876_v2 = vadd.f32 %v1868_v29, %v1842_v53 }
 0x3ba   : > { %v1953_v59 = vadd.f32 %v1944_v21, %v1929_v25 }
 0x3bb   : > { %v1896_v58 = vpop.permute.xlu1 %1895  ;;  %v1970_v60 = vpop.permute.xlu0 %1969 }
 0x3bc   : > { %v1904_v39 = vadd.f32 %v1896_v58, %v1876_v2  ;;  %v1981_v33 = vadd.f32 %v1970_v60, %v1953_v59  ;;  %v2084_v58 = vld [vmem:[%s5870_s23 + $0x90] sm:$0xff] }
 0x3bf   : > { %v1924_v61 = vpop.permute.xlu1 %1923  ;;  %v1998_v62 = vpop.permute.xlu0 %1997 }
 0x3c0   : > { %v1932_v14 = vadd.f32 %v1924_v61, %v1904_v39  ;;  %v2009_v16 = vadd.f32 %v1998_v62, %v1981_v33 }
 0x3c2   : > { %v1956_v30 = vadd.f32 %v1947_v11, %v1932_v14  ;;  %v2020_v31 = vadd.f32 %v3219_v18, %v2009_v16  ;;  %v2086_v14 = vld [vmem:[%s5870_s23 + $0xa0] sm:$0xff] }
 0x3c3   : > { %v1976_v3 = vpop.permute.xlu1 %1975  ;;  %v1864_v7 = vpop.permute.xlu0 %1863 }
 0x3c4   : > { %v1874_v57 = vadd.f32 %v1864_v7, %v5242_v24  ;;  %v1984_v40 = vadd.f32 %v1976_v3, %v1956_v30  ;;  %v2024_v41 = vmax.f32 %v2020_v31, 0.0  ;;  %v2085_v3 = vld [vmem:[%s5870_s23 + $0x98] sm:$0xff]  ;;  %v2075_v30 = vld [vmem:[%s5870_s23 + $0x48] sm:$0xff] }
 0x3c5   : > { %v2069_v7 = vld [vmem:[%s5870_s23 + $0x18] sm:$0xff] }
 0x3c6   : > { %v2053_v60 = vrot.slane %v2024_v41, 1 }
 0x3c7   : > { %v1866_v19 = vpop.permute.xlu1 %1865  ;;  %v1894_v46 = vpop.permute.xlu0 %1893 }
 0x3c8   : > { %v1875_v27 = vadd.f32 %v1866_v19, %v5255_v38  ;;  %v1948_v38 = vsel %vm1941_vm0, %v1945_v43, %v1947_v11  ;;  %v2032_v43 = vadd.s32 %v2030_v12, %v5223_v6 }
 0x3ca   : > { %v1903_v13 = vadd.f32 %v1894_v46, %v1875_v27  ;;  %vm2035_vm2 = vcmp.ge.s32.totalorder %v2032_v43, 0  ;;  %vm2038_vm3 = vcmp.lt.s32.totalorder %v2032_v43, 40  ;;  %v3424_v27 = vpack.c.bf16 %v2085_v3, %v2084_v58  ;;  %v2087_v43 = vld [vmem:[%s5870_s23 + $0xa8] sm:$0xff]  ;;  %v2093_v3 = vld [vmem:[%s5870_s23 + $0xd8] sm:$0xff] }
 0x3cb   : > { %v1892_v23 = vpop.permute.xlu1 %1891  ;;  %v1922_v48 = vpop.permute.xlu0 %1921  ;;  %vm5376_vm7 = vmand %vm2035_vm2, %vm2038_vm3  ;;  %v3400_v46 = vpack.c.bf16 %v2069_v7, %v2068_v5 }
 0x3cc   : > { %v1931_v0 = vadd.f32 %v1922_v48, %v1903_v13  ;;  %v1902_v4 = vadd.f32 %v1892_v23, %v1874_v57  ;;  %vm2042_vm2 = vmand %vm2036_vm8, %vm2039_vm9 }
 0x3ce   : > { %v1955_v10 = vadd.f32 %v1948_v38, %v1931_v0 }
 0x3cf   : > { %v1920_v8 = vpop.permute.xlu1 %1919  ;;  %v1974_v56 = vpop.permute.xlu0 %1973 }
 0x3d0   : > { %v1930_v45 = vadd.f32 %v1920_v8, %v1902_v4  ;;  %v1983_v42 = vadd.f32 %v1974_v56, %v1955_v10 }
 0x3d2   : > { %v1954_v24 = vadd.f32 %v5280_v1, %v1930_v45 }
 0x3d3   : > { %v1972_v20 = vpop.permute.xlu1 %1971  ;;  %v2002_v22 = vpop.permute.xlu0 %2001 }
 0x3d4   : > { %v2011_v28 = vadd.f32 %v2002_v22, %v1983_v42  ;;  %v1982_v34 = vadd.f32 %v1972_v20, %v1954_v24 }
 0x3d6   : > { %v2022_v37 = vadd.f32 %v3219_v18, %v2011_v28  ;;  %v2074_v28 = vld [vmem:[%s5870_s23 + $0x40] sm:$0xff] }
 0x3d7   : > { %v2000_v35 = vpop.permute.xlu1 %1999 }
 0x3d8   : > { %v2010_v1 = vadd.f32 %v2000_v35, %v1982_v34  ;;  %v2026_v49 = vmax.f32 %v2022_v37, 0.0 }
 0x3da   : > { %v2021_v47 = vadd.f32 %v3219_v18, %v2010_v1  ;;  %v2056_v63 = vrot.slane %v2026_v49, 1  ;;  %v3404_v49 = vpack.c.bf16 %v2075_v30, %v2074_v28 }
 0x3db   : > { %v2004_v6 = vpop.permute.xlu1 %2003 }
 0x3dc   : > { %v2025_v29 = vmax.f32 %v2021_v47, 0.0  ;;  %v2012_v55 = vadd.f32 %v2004_v6, %v1984_v40  ;;  %v3428_v47 = vpack.c.bf16 %v2087_v43, %v2086_v14 }
 0x3de   : > { %v2054_v61 = vrot.slane %v2025_v29, 1  ;;  %v2023_v62 = vadd.f32 %v3219_v18, %v2012_v55  ;;  %v2076_v29 = vld [vmem:[%s5870_s23 + $0x50] sm:$0xff]  ;;  %v2077_v55 = vld [vmem:[%s5870_s23 + $0x58] sm:$0xff] }
 0x3df   : > { %v3408_v58 = vpack.c.bf16 %v2077_v55, %v2076_v29 }
 0x3e0   : > { %v2055_v9 = vsel %vm1853_vm12, %v2053_v60, %v2054_v61  ;;  %v2027_v15 = vmax.f32 %v2023_v62, 0.0  ;;  %v2057_v17 = vsel %vm1853_vm12, %v2054_v61, %v2056_v63  ;;  %v2090_v60 = vld [vmem:[%s5870_s23 + $0xc0] sm:$0xff]  ;;  %v2091_v61 = vld [vmem:[%s5870_s23 + $0xc8] sm:$0xff] }
 0x3e1   : > { %v2063_v19 = vsel %vm5372_vm6, %v2055_v9, 0.0  ;;  %v2064_v25 = vsel %vm5376_vm7, %v2057_v17, 0.0  ;;  %v3436_v62 = vpack.c.bf16 %v2091_v61, %v2090_v60  ;;  %v3235_v17 = vld [vmem:[%s5876_s28] ss:$0 sm:$0xff] }
 0x3e2   : > { %v2058_v50 = vrot.slane %v2027_v15, 1  ;;  %v2097_v11 = vrot.slane %v2063_v19, 2  ;;  %v2098_v13 = vrot.slane %v2064_v25, 2  ;;  %v2352_v21 = vrot.slane %v2063_v19, 4 }
 0x3e3   : > { %v2353_v23 = vrot.slane %v2064_v25, 4  ;;  %v2182_v59 = vrot.slane %v2063_v19, 1  ;;  %v2183_v57 = vrot.slane %v2064_v25, 1  ;;  %v2438_v48 = vrot.slane %v2063_v19, 5 }
 0x3e4   : > { %v2059_v53 = vsel %vm1853_vm12, %v2056_v63, %v2058_v50  ;;  %v2099_v0 = vsel %vm1881_vm13, %v2097_v11, %v2098_v13  ;;  %v2439_v2 = vrot.slane %v2064_v25, 5  ;;  %v2266_v4 = vrot.slane %v2063_v19, 3  ;;  %v2092_v63 = vld [vmem:[%s5870_s23 + $0xd0] sm:$0xff] }
 0x3e5   : > { %v2065_v38 = vsel %vm2042_vm2, %v2059_v53, 0.0  ;;  %3319 = vmatprep.mubr.msk.f32.mxu0 %vm2102_vm10, %v2099_v0  ;;  %v2354_v8 = vsel %vm1941_vm0, %v2352_v21, %v2353_v23  ;;  %v2184_v10 = vsel %vm1853_vm12, %v2182_v59, %v2183_v57  ;;  %v2267_v39 = vrot.slane %v2064_v25, 3 }
 0x3e6   : > { %3352 = vmatprep.mubr.msk.f32.mxu1 %vm2102_vm10, %v2354_v8  ;;  %v2100_v33 = vrot.slane %v2065_v38, 2  ;;  %v2355_v45 = vrot.slane %v2065_v38, 4  ;;  %v2440_v56 = vsel %vm1961_vm14, %v2438_v48, %v2439_v2  ;;  %v2185_v12 = vrot.slane %v2065_v38, 1 }
 0x3e7   : > { %v2441_v16 = vrot.slane %v2065_v38, 5  ;;  %v2268_v24 = vsel %vm1909_vm1, %v2266_v4, %v2267_v39  ;;  %v2524_v18 = vrot.slane %v2063_v19, 6  ;;  %v2525_v20 = vrot.slane %v2064_v25, 6 }
 0x3e8   : > { %v2101_v42 = vsel %vm1881_vm13, %v2098_v13, %v2100_v33  ;;  %v2356_v22 = vsel %vm1941_vm0, %v2353_v23, %v2355_v45  ;;  %v2186_v26 = vsel %vm1853_vm12, %v2183_v57, %v2185_v12  ;;  %v2269_v31 = vrot.slane %v2065_v38, 3 }
 0x3e9   : > { %3320 = vmatmul.mubr.msk.f32.vlgmr.msra.gmra.mrb[8].mxu0 %vm2102_vm10, %v2101_v42  ;;  %3353 = vmatmul.mubr.msk.f32.vlgmr.msra.gmra.mrb[8].mxu1 %vm2102_vm10, %v2356_v22  ;;  %v2442_v34 = vsel %vm1961_vm14, %v2439_v2, %v2441_v16  ;;  %v2526_v35 = vsel %vm1989_vm15, %v2524_v18, %v2525_v20  ;;  %v2527_v36 = vrot.slane %v2065_v38, 6  ;;  %v2611_v37 = vrot.slane %v2063_v19, 7 }
 0x3ea   : > { %3423 = vmatpush3.bf16.msra.mxu1 %v5343_v44  ;;  %3399 = vmatpush3.bf16.msra.mxu0 %v5352_v51  ;;  %v2270_v1 = vsel %vm1909_vm1, %v2267_v39, %v2269_v31  ;;  %v2612_v40 = vrot.slane %v2064_v25, 7  ;;  %v2614_v41 = vrot.slane %v2065_v38, 7  ;;  %v2088_v44 = vld [vmem:[%s5870_s23 + $0xb0] sm:$0xff]  ;;  %v3440_v5 = vpack.c.bf16 %v2093_v3, %v2092_v63 }
 0x3eb   : > { %3330 = vmatprep.mubr.msk.f32.mxu0 %vm2102_vm10, %v2184_v10  ;;  %3363 = vmatprep.mubr.msk.f32.mxu1 %vm2102_vm10, %v2440_v56  ;;  %v2528_v6 = vsel %vm1989_vm15, %v2525_v20, %v2527_v36  ;;  %v3432_v32 = vpack.c.bf16 %v2089_v54, %v2088_v44  ;;  %vm2706_vm12 = vcmask 162816  }
 0x3ec   : > { %3425 = vmatprep.subr.bf16.mxu1 %v3424_v27  ;;  %3401 = vmatprep.subr.bf16.mxu0 %v3400_v46  ;;  %v2613_v51 = vsel %vm2610_vm11, %v2611_v37, %v2612_v40  ;;  %v2615_v52 = vsel %vm2610_vm11, %v2612_v40, %v2614_v41 }
 0x3ee   : > { %3427 = vmatpush3.bf16.msra.mxu1 %v3424_v27  ;;  %3403 = vmatpush3.bf16.msra.mxu0 %v3400_v46 }
 0x3ef   : > { %3429 = vmatprep.subr.bf16.mxu1 %v3428_v47  ;;  %3405 = vmatprep.subr.bf16.mxu0 %v3404_v49 }
 0x3f1   : > { %3331 = vmatmul.mubr.msk.f32.vlgmr.msra.gmra.mrb[8].mxu0 %vm2102_vm10, %v2186_v26  ;;  %3364 = vmatmul.mubr.msk.f32.vlgmr.msra.gmra.mrb[8].mxu1 %vm2102_vm10, %v2442_v34 }
 0x3f2   : > { %3431 = vmatpush3.bf16.msra.mxu1 %v3428_v47  ;;  %3407 = vmatpush3.bf16.msra.mxu0 %v3404_v49 }
 0x3f3   : > { %3341 = vmatprep.mubr.msk.f32.mxu0 %vm2102_vm10, %v2268_v24  ;;  %3374 = vmatprep.mubr.msk.f32.mxu1 %vm2102_vm10, %v2526_v35 }
 0x3f4   : > { %3433 = vmatprep.subr.bf16.mxu1 %v3432_v32  ;;  %3409 = vmatprep.subr.bf16.mxu0 %v3408_v58 }
 0x3f6   : > { %3435 = vmatpush3.bf16.msra.mxu1 %v3432_v32  ;;  %3411 = vmatpush3.bf16.msra.mxu0 %v3408_v58 }
 0x3f7   : > { %3437 = vmatprep.subr.bf16.mxu1 %v3436_v62 }
 0x3f9   : > { %3342 = vmatmul.mubr.msk.f32.vlgmr.msra.gmra.mrb[8].mxu0 %vm2102_vm10, %v2270_v1  ;;  %3375 = vmatmul.mubr.msk.f32.vlgmr.msra.gmra.mrb[8].mxu1 %vm2102_vm10, %v2528_v6 }
 0x3fa   : > { %3439 = vmatpush3.bf16.msra.mxu1 %v3436_v62  ;;  %3385 = vmatprep.mubr.msk.f32.mxu1 %vm2102_vm10, %v2613_v51 }
 0x3fb   : > { %3441 = vmatprep.subr.bf16.mxu1 %v3440_v5 }
 0x3fe   : > { %3443 = vmatpush3.bf16.msra.mxu1 %v3440_v5 }
 0x401   : > { %3386 = vmatmul.mubr.msk.f32.vlgmr.msra.gmra.mrb[8].mxu1 %vm2102_vm10, %v2615_v52 }
 0x4cc   : > { %v3343_v7 = vpop.f32.mrb[8].mxu0 }
 0x4cd   : > { %v2341_v9 = vpop.f32.mrb[9].mxu0 }
 0x4d4   : > { %v3387_v15 = vpop.f32.mrb[8].mxu1 }
 0x4d5   : > { %v3446_v19 = vadd.f32 %v3387_v15, %v3343_v7  ;;  %v2686_v25 = vpop.f32.mrb[9].mxu1 }
 0x4d6   : > { %v3447_v27 = vadd.f32 %v2686_v25, %v2341_v9 }
 0x4d7   : > { %v2705_v46 = vadd.f32 %v3446_v19, %v3235_v17 }
 0x4d8   : > { %v2704_v50 = vadd.f32 %v3447_v27, %v3235_v17 }
 0x4d9   : > { %v2710_v11 = vsel %vm2706_vm12, %v2705_v46, -inf }
 0x4da   : > { %2711 = vmax.xlane.f32.xlu1 %v2710_v11  ;;  %v2707_v13 = vsel %vm2706_vm12, %v2704_v50, -inf }
 0x4db   : > { %2708 = vmax.xlane.f32.xlu0 %v2707_v13 }
 0x567   : > { %v2712_v21 = vpop.xlane.xlu1 %2711 }
 0x568   : > { %v2714_v23 = vsub.f32 %v2705_v46, %v2712_v21  ;;  %v2709_v59 = vpop.xlane.xlu0 %2708 }
 0x569   : > { %v2713_v57 = vsub.f32 %v2704_v50, %v2709_v59 }
 0x56a   : > { %v2717_v48 = vmul.f32 1.442695, %v2714_v23 }
 0x56b   : > { %v2715_v53 = vmul.f32 1.442695, %v2713_v57 }
 0x56d   : > { %3885 = vpow2.f32 %v2715_v53 }
 0x56e   : > { %3887 = vpow2.f32 %v2717_v48 }
 0x577   : > { %v3886_v0 = vpop.eup %3885 }
 0x578   : > { %v2719_v2 = vsel %vm2706_vm12, %v3886_v0, 0.0  ;;  %v3888_v4 = vpop.eup %3887 }
 0x579   : > { %2720 = vadd.xlane.f32.xlu0 %v2719_v2  ;;  %v2722_v38 = vsel %vm2706_vm12, %v3888_v4, 0.0 }
 0x57d   : > { %2723 = vadd.xlane.f32.xlu0 %v2722_v38 }
 0x606   : > { %v2721_v8 = vpop.xlane.xlu0 %2720 }
 0x607   : > { %3889 = vrcp.f32 %v2721_v8 }
 0x60a   : > { %v2724_v10 = vpop.xlane.xlu0 %2723 }
 0x60b   : > { %3891 = vrcp.f32 %v2724_v10 }
 0x611   : > { %v3890_v39 = vpop.eup %3889 }
 0x612   : > { %v2726_v33 = vmul.f32 %v3890_v39, %v3886_v0  ;;  %2737 = sbr.rel (!%p5878_p7) target bundleno = 1610 (0x64a), region = 68 }
 0x614   : > { %2729 = vst.msk [vmem:[%s5473_s16] sm:$0xff] %vm2706_vm12, %v2726_v33 }
 0x615   : > { %v3892_v45 = vpop.eup %3891 }
 0x616   : > { %v2728_v56 = vmul.f32 %v3892_v45, %v3888_v4 }
 0x618   : > { %2730 = vst.msk [vmem:[%s5473_s16 + $0x8] sm:$0xff] %vm2706_vm12, %v2728_v56 }
 0x619   : > { %s5918_s4 = smov (!%p2740_p10, %s2739_s4), 2 }
 0x61a   : > { %s3238_s24 = sshll.u32 %s5918_s4, 7 }
 0x61b   : > { %p3241_p1 = scmp.eq.s32.totalorder %s3238_s24, 0 }
 0x61c   : > { %s5492_s7 = sshrl.u32 (!%p3241_p1), %s5918_s4, 1 }
 0x61d   : > { %2750 = sbr.rel (%p3241_p1) target bundleno = 1610 (0x64a), region = 72  ;;  %p3242_p8 = scmp.le.s32.totalorder (!%p3241_p1), %s5492_s7, 0 }
 0x624   : > { %2954 = sbr.rel (%p3242_p8) target bundleno = 1589 (0x635), region = 170  ;;  %s4179_s10 = smov (!%p3242_p8), %s5488_s6  }
 0x625   : > { %s4183_s19 = smov (!%p3242_p8), %s5473_s16   ;;  %s4187_s3 = smov (!%p3242_p8), 0  }
 0x626   : > { %s4191_s28 = smov (!%p3242_p8), 0  }
 0x62b LB: >> { %v2814_v12 = vld [vmem:[%s4185_s19] sm:$0xff]  ;;  %v2816_v14 = vld [vmem:[%s4185_s19 + $0x8] sm:$0xff]  ;;  %s2818_s22 = sadd.s32 1, %s4189_s3  ;;  %s2808_s28 = sadd.s32 1, %s4193_s28   ;;  %s4193_s28 = sphi %s4191_s28, %s2808_s28   ;;  %s4189_s3 = sphi %s4187_s3, %s4188_s3   ;;  %s4185_s19 = sphi %s4183_s19, %s2823_s19   ;;  %s4181_s10 = sphi %s4179_s10, %s2824_s10  }
 0x62c   : >> { %2815 = vst [vmem:[%s4181_s10] sm:$0xff] %v2814_v12  ;;  %2817 = vst [vmem:[%s4181_s10 + $0x8] sm:$0xff] %v2816_v14  ;;  %p2819_p13 = scmp.ge.s32.totalorder %s2818_s22, %s5492_s7  ;;  %p2807_p9 = scmp.ge.s32.totalorder %s2808_s28, %s5492_s7 }
 0x62e   : >> { %s5920_s22 = smov (%p2819_p13, %s2818_s22), 0  ;;  %2810 = sbr.rel (!%p2807_p9) target bundleno = 1579 (0x62b), region = 176 }
 0x62f   : >> { %s3243_s18 = sshll.u32 %s5920_s22, 4  ;;  %s4188_s3 = smov %s5920_s22  }
 0x630   : >> { %s2823_s19 = scalar_lea.vmem %s5473_s16, %s3243_s18 [#allocation10]   ;;  %s2824_s10 = scalar_lea.vmem %s5488_s6, %s3243_s18  }
 0x635 PF: > { %s5502_s27 = sand.u32 1, %s5918_s4   ;;  %s3267_s11 = sshll.u32 %s5492_s7, 4 }
 0x636   : > { %s2829_s21 = scalar_lea.vmem %s5473_s16, %s3267_s11 [#allocation10]   ;;  %s2831_s15 = scalar_lea.vmem %s5488_s6, %s3267_s11  }
 0x637   : > { %p3248_p4 = scmp.le.s32.totalorder %s5502_s27, 0 }
 0x638   : > { %s4195_s17 = smov (!%p3248_p4), %s2831_s15   ;;  %s4199_s30 = smov (!%p3248_p4), %s2829_s21  }
 0x639   : > { %2968 = sbr.rel (%p3248_p4) target bundleno = 1610 (0x64a), region = 181  ;;  %s4203_s20 = smov (!%p3248_p4), 0  }
 0x63a   : > { %s4207_s25 = smov (!%p3248_p4), 0  }
 0x640 LB: >> { %v2841_v16 = vld [vmem:[%s4201_s30] sm:$0xff]  ;;  %s2843_s4 = sadd.s32 1, %s4205_s20  ;;  %s2835_s25 = sadd.s32 1, %s4209_s25   ;;  %s4209_s25 = sphi %s4207_s25, %s2835_s25   ;;  %s4205_s20 = sphi %s4203_s20, %s4204_s20   ;;  %s4201_s30 = sphi %s4199_s30, %s2848_s30   ;;  %s4197_s17 = sphi %s4195_s17, %s2849_s17  }
 0x641   : >> { %2842 = vst [vmem:[%s4197_s17] sm:$0xff] %v2841_v16  ;;  %p2844_p0 = scmp.ge.s32.totalorder %s2843_s4, %s5502_s27  ;;  %p2834_p11 = scmp.ge.s32.totalorder %s2835_s25, %s5502_s27 }
 0x643   : >> { %s5922_s4 = smov (%p2844_p0, %s2843_s4), 0  ;;  %2837 = sbr.rel (!%p2834_p11) target bundleno = 1600 (0x640), region = 187 }
 0x644   : >> { %s3249_s16 = sshll.u32 %s5922_s4, 3  ;;  %s4204_s20 = smov %s5922_s4  }
 0x645   : >> { %s2848_s30 = scalar_lea.vmem %s2829_s21, %s3249_s16 [#allocation10]   ;;  %s2849_s17 = scalar_lea.vmem %s2831_s15, %s3249_s16  }
 0x64a PF: > { %s24_s14 = sadd.s32 1, %s4177_s14   ;;  %s5883_s24 = sld [smem:[#allocation15_spill]] }
 0x64b   : > { %p5511_p12 = scmp.ge.s32.totalorder %s24_s14, 8   ;;  %s5884_s6 = sld [smem:[#allocation26_spill]] }
 0x64c   : > { %s5885_s27 = sld [smem:[#allocation16_spill]]  ;;  %s5886_s7 = sld [smem:[#allocation23_spill]] }
 0x64d   : > { %s5887_s10 = sld [smem:[#allocation21_spill]]  ;;  %s5888_s19 = sld [smem:[#allocation19_spill]] }
 0x64e   : > { %s5889_s3 = sld [smem:[#allocation20_spill]]  ;;  %s5890_s25 = smov %s4133_s26 }
 0x64f   : > { %s5892_s28 = smov %s4145_s29  ;;  %s5894_s30 = smov %s4153_s8 }
 0x650   : > { %s5895_s8 = smov %s4157_s9  ;;  %s5898_s11 = smov %s4173_s13 }
 0x651   : > { %s5891_s26 = smov %s5884_s6  ;;  %23 = sbr.rel (!%p5511_p12) target bundleno = 17 (0x11), region = 198 }
 0x652   : > { %s5893_s29 = smov %s5886_s7 }
 0x653   : > { %s5896_s9 = smov %s5887_s10  ;;  %s5897_s10 = smov %s4169_s12 }
 0x654   : > { %s5899_s12 = smov %s5888_s19  ;;  %s5900_s13 = smov %s5889_s3 }
 0x658   :  { %2865 = vsyncpa [#allocation4], 1 }
 0x659   :  { %2867 = vsyncpa [#allocation4 + $0x1], 1 }
 0x65a   :  { %2868 = vsyncpa [#allocation6], 1 }
 0x65b   :  { %2870 = vsyncpa [#allocation6 + $0x1], 1 }
 0x65c   :  { %2871 = vsyncpa [#allocation9], 1 }

</bundles_post_ra>
